<compile_context>
chip_gen: v7x
topology: tpu7x:2x2x1
jax: 0.10.0
libtpu: 0.0.40
codegen_flags: <defaults>
</compile_context>

<pallas_src>
import math
import functools

import jax
import jax.numpy as jnp
from jax.experimental import pallas as pl
from jax.experimental.pallas import tpu as pltpu

PAD = 0          # utils.TOKENS['PAD']
MAX_LEN = 64     # utils.MAX_LEN (synthetic)
LN_EPS = 1e-5    # torch.nn.LayerNorm default


# ----------------------------- Pallas kernels ------------------------------

def _layernorm(x, gamma, beta):
    mean = jnp.mean(x, axis=-1, keepdims=True)
    ctr = x - mean
    var = jnp.mean(ctr * ctr, axis=-1, keepdims=True)
    return ctr * jax.lax.rsqrt(var + LN_EPS) * gamma + beta


def _softmax_rows(s):
    mx = jnp.max(s, axis=-1, keepdims=True)
    p = jnp.exp(s - mx)
    return p * pl.reciprocal(jnp.sum(p, axis=-1, keepdims=True), approx=True)


def _make_self_attn_sublayer_kernel(H, dk):
    """x -> x + Wo @ MHA(LN(x), LN(x), LN(x), mask). One batch element per step."""
    D = H * dk

    def kernel(x_ref, wqkv_ref, bqkv_ref, wo_ref, bo_ref, g_ref, bln_ref,
               mask_ref, o_ref):
        x = x_ref[...]                                            # (S, D)
        y = _layernorm(x, g_ref[...], bln_ref[...])
        # fused QKV; Q part pre-scaled by 1/sqrt(dk) at param-prep time.
        qkv = jnp.dot(y, wqkv_ref[...],
                      preferred_element_type=jnp.float32) + bqkv_ref[...]   # (S, 3D)
        m = mask_ref[...]                                         # (1, Sk) additive
        acc = jnp.zeros_like(x)                                   # (S, D)
        for hd in range(H):                                       # unrolled heads
            q = qkv[:, hd * dk:(hd + 1) * dk]
            k = qkv[:, D + hd * dk:D + (hd + 1) * dk]
            v = qkv[:, 2 * D + hd * dk:2 * D + (hd + 1) * dk]
            s = jax.lax.dot_general(q, k, (((1,), (1,)), ((), ())),
                                    preferred_element_type=jnp.float32) + m
            p = _softmax_rows(s)
            ah = jnp.dot(p, v, preferred_element_type=jnp.float32)          # (S, dk)
            # per-head slice of output projection, accumulated (== concat @ Wo)
            acc = acc + jnp.dot(ah, wo_ref[hd * dk:(hd + 1) * dk, :],
                                preferred_element_type=jnp.float32)
        o_ref[...] = x + acc + bo_ref[...]                        # residual add

    return kernel


def _make_cross_attn_sublayer_kernel(H, dk):
    """x -> x + Wo @ MHA(LN(x), mem, mem, mask). One batch element per step."""
    D = H * dk

    def kernel(x_ref, kv_ref, wq_ref, bq_ref, wkv_ref, bkv_ref, wo_ref, bo_ref,
               g_ref, bln_ref, mask_ref, o_ref):
        x = x_ref[...]                                            # (Sq, D)
        y = _layernorm(x, g_ref[...], bln_ref[...])
        q_all = jnp.dot(y, wq_ref[...],
                        preferred_element_type=jnp.float32) + bq_ref[...]   # (Sq, D)
        kv = jnp.dot(kv_ref[...], wkv_ref[...],
                     preferred_element_type=jnp.float32) + bkv_ref[...]     # (Sk, 2D)
        m = mask_ref[...]                                         # (1, Sk)
        acc = jnp.zeros_like(x)
        for hd in range(H):
            q = q_all[:, hd * dk:(hd + 1) * dk]
            k = kv[:, hd * dk:(hd + 1) * dk]
            v = kv[:, D + hd * dk:D + (hd + 1) * dk]
            s = jax.lax.dot_general(q, k, (((1,), (1,)), ((), ())),
                                    preferred_element_type=jnp.float32) + m
            p = _softmax_rows(s)
            ah = jnp.dot(p, v, preferred_element_type=jnp.float32)
            acc = acc + jnp.dot(ah, wo_ref[hd * dk:(hd + 1) * dk, :],
                                preferred_element_type=jnp.float32)
        o_ref[...] = x + acc + bo_ref[...]

    return kernel


def _ffn_sublayer_kernel(x_ref, w1_ref, b1_ref, w2_ref, b2_ref, g_ref, bln_ref,
                         o_ref):
    # x -> x + W2 @ relu(W1 @ LN(x) + b1) + b2     (dropout = identity at eval)
    x = x_ref[...]                                                # (M, D)
    y = _layernorm(x, g_ref[...], bln_ref[...])
    h = jnp.dot(y, w1_ref[...], preferred_element_type=jnp.float32) + b1_ref[...]
    h = jnp.maximum(h, 0.0)
    o_ref[...] = x + jnp.dot(h, w2_ref[...],
                             preferred_element_type=jnp.float32) + b2_ref[...]


def _layernorm_kernel(x_ref, g_ref, b_ref, o_ref):
    o_ref[...] = _layernorm(x_ref[...], g_ref[...], b_ref[...])


# ----------------------------- pallas_call wrappers -------------------------

def attn_sublayer_self(p, x, add_mask, h):
    """Fused: x + MHA(LN(x)) with self-attention (q = k = v = LN(x))."""
    B, S, D = x.shape
    dk = D // h
    kernel = _make_self_attn_sublayer_kernel(h, dk)
    return pl.pallas_call(
        kernel,
        out_shape=jax.ShapeDtypeStruct((B, S, D), jnp.float32),
        grid=(B,),
        in_specs=[
            pl.BlockSpec((None, S, D), lambda b: (b, 0, 0)),    # x
            pl.BlockSpec((D, 3 * D), lambda b: (0, 0)),         # wqkv (Q pre-scaled)
            pl.BlockSpec((1, 3 * D), lambda b: (0, 0)),         # bqkv
            pl.BlockSpec((D, D), lambda b: (0, 0)),             # wo
            pl.BlockSpec((1, D), lambda b: (0, 0)),             # bo
            pl.BlockSpec((1, D), lambda b: (0, 0)),             # ln gamma
            pl.BlockSpec((1, D), lambda b: (0, 0)),             # ln beta
            pl.BlockSpec((None, 1, S), lambda b: (b, 0, 0)),    # additive mask
        ],
        out_specs=pl.BlockSpec((None, S, D), lambda b: (b, 0, 0)),
        compiler_params=pltpu.CompilerParams(
            dimension_semantics=("parallel",)),
    )(x, p["wqkv"], p["bqkv"], p["wo"], p["bo"], p["gamma"], p["beta"], add_mask)


def attn_sublayer_cross(p, x, mem, add_mask, h):
    """Fused: x + MHA(LN(x), mem, mem) cross-attention sublayer."""
    B, Sq, D = x.shape
    Sk = mem.shape[1]
    dk = D // h
    kernel = _make_cross_attn_sublayer_kernel(h, dk)
    return pl.pallas_call(
        kernel,
        out_shape=jax.ShapeDtypeStruct((B, Sq, D), jnp.float32),
        grid=(B,),
        in_specs=[
            pl.BlockSpec((None, Sq, D), lambda b: (b, 0, 0)),   # x (query side)
            pl.BlockSpec((None, Sk, D), lambda b: (b, 0, 0)),   # memory (kv side)
            pl.BlockSpec((D, D), lambda b: (0, 0)),             # wq (pre-scaled)
            pl.BlockSpec((1, D), lambda b: (0, 0)),             # bq (pre-scaled)
            pl.BlockSpec((D, 2 * D), lambda b: (0, 0)),         # wkv
            pl.BlockSpec((1, 2 * D), lambda b: (0, 0)),         # bkv
            pl.BlockSpec((D, D), lambda b: (0, 0)),             # wo
            pl.BlockSpec((1, D), lambda b: (0, 0)),             # bo
            pl.BlockSpec((1, D), lambda b: (0, 0)),             # ln gamma
            pl.BlockSpec((1, D), lambda b: (0, 0)),             # ln beta
            pl.BlockSpec((None, 1, Sk), lambda b: (b, 0, 0)),   # additive mask
        ],
        out_specs=pl.BlockSpec((None, Sq, D), lambda b: (b, 0, 0)),
        compiler_params=pltpu.CompilerParams(
            dimension_semantics=("parallel",)),
    )(x, mem, p["wq"], p["bq"], p["wkv"], p["bkv"], p["wo"], p["bo"],
      p["gamma"], p["beta"], add_mask)


def ffn_sublayer(p, x):
    """Fused: x + FFN(LN(x)) over the flattened (B*S, D) row block."""
    B, S, D = x.shape
    d_ff = p["w1"].shape[1]
    M = B * S
    # TODO(synk): at production sizes, tile M into a "parallel" grid axis and
    # set vmem_limit_bytes; at M=16 a single whole-array block is optimal.
    out = pl.pallas_call(
        _ffn_sublayer_kernel,
        out_shape=jax.ShapeDtypeStruct((M, D), jnp.float32),
        grid=(1,),
        in_specs=[pl.BlockSpec((M, D), lambda i: (0, 0)),
                  pl.BlockSpec((D, d_ff), lambda i: (0, 0)),
                  pl.BlockSpec((1, d_ff), lambda i: (0, 0)),
                  pl.BlockSpec((d_ff, D), lambda i: (0, 0)),
                  pl.BlockSpec((1, D), lambda i: (0, 0)),
                  pl.BlockSpec((1, D), lambda i: (0, 0)),
                  pl.BlockSpec((1, D), lambda i: (0, 0))],
        out_specs=pl.BlockSpec((M, D), lambda i: (0, 0)),
    )(x.reshape(M, D), p["w1"], p["b1"], p["w2"], p["b2"], p["gamma"], p["beta"])
    return out.reshape(B, S, D)


def final_layernorm(x, norm_p):
    B, S, D = x.shape
    M = B * S
    out = pl.pallas_call(
        _layernorm_kernel,
        out_shape=jax.ShapeDtypeStruct((M, D), jnp.float32),
        grid=(1,),
        in_specs=[pl.BlockSpec((M, D), lambda i: (0, 0)),
                  pl.BlockSpec((1, D), lambda i: (0, 0)),
                  pl.BlockSpec((1, D), lambda i: (0, 0))],
        out_specs=pl.BlockSpec((M, D), lambda i: (0, 0)),
    )(x.reshape(M, D), norm_p["gamma"], norm_p["beta"])
    return out.reshape(B, S, D)


# ----------------------------- model (JAX glue) -----------------------------

def positional_embedding(p, tokens, d_model):
    # embedding gather + PE add stay in JAX (no rectangular BlockSpec gather).
    emb = p["emb"][tokens] * math.sqrt(d_model)
    return emb + p["pe"][: tokens.shape[1]][None, :, :]   # dropout = identity


def encoder_forward(prep, x, add_mask, h):
    for layer in prep["layers"]:
        x = attn_sublayer_self(layer["mha"], x, add_mask, h)
        x = ffn_sublayer(layer["ff"], x)
    return final_layernorm(x, prep["norm"])


def decoder_forward(prep, x, mem, add_src_mask, add_tgt_mask, h, self_attn):
    for layer in prep["layers"]:
        if self_attn:
            x = attn_sublayer_self(layer["self_mha"], x, add_tgt_mask, h)
        x = attn_sublayer_cross(layer["cross_mha"], x, mem, add_src_mask, h)
        x = ffn_sublayer(layer["ff"], x)
    return final_layernorm(x, prep["norm"])


def encoder_decoder_forward(prep, src, tgt, cfg):
    h, d_model = cfg["h"], cfg["d_model"]
    # Additive masks: 0 where attendable, -1e9 where masked (matches the
    # float32 masked_fill value in the reference attention()).
    src_add_mask = ((src != PAD).astype(jnp.float32) - 1.0)[:, None, :] * 1.0e9
    # tgt mask is all-ones in the reference (non-causal target self-attention).
    tgt_add_mask = jnp.zeros((tgt.shape[0], 1, tgt.shape[1]), jnp.float32)

    src_emb = positional_embedding(prep["src_pos_embed"], src, d_model)
    memory = encoder_forward(prep["encoder"], src_emb, src_add_mask, h)
    tgt_emb = positional_embedding(prep["tgt_pos_embed"], tgt, d_model)
    return decoder_forward(prep["decoder"], tgt_emb, memory,
                           src_add_mask, tgt_add_mask, h,
                           cfg["decoder_self_attn"])


# ----------------------------- parameter init -------------------------------

def _xavier(key, fan_in, fan_out):
    lim = math.sqrt(6.0 / (fan_in + fan_out))
    return jax.random.uniform(key, (fan_in, fan_out), jnp.float32, -lim, lim)


def init_mha(key, d_model):
    ks = jax.random.split(key, 4)
    return {"wq": _xavier(ks[0], d_model, d_model), "bq": jnp.zeros((d_model,)),
            "wk": _xavier(ks[1], d_model, d_model), "bk": jnp.zeros((d_model,)),
            "wv": _xavier(ks[2], d_model, d_model), "bv": jnp.zeros((d_model,)),
            "wo": _xavier(ks[3], d_model, d_model), "bo": jnp.zeros((d_model,))}


def init_ff(key, d_model, d_ff):
    k1, k2 = jax.random.split(key)
    return {"w1": _xavier(k1, d_model, d_ff), "b1": jnp.zeros((d_ff,)),
            "w2": _xavier(k2, d_ff, d_model), "b2": jnp.zeros((d_model,))}


def init_norm(d_model):
    return {"gamma": jnp.ones((d_model,)), "beta": jnp.zeros((d_model,))}


def make_pe(d_model):
    pos = jnp.arange(MAX_LEN, dtype=jnp.float32)[:, None]
    div = jnp.exp(jnp.arange(0, d_model, 2, dtype=jnp.float32)
                  * -(math.log(10000.0) / d_model))
    pe = jnp.zeros((MAX_LEN, d_model), jnp.float32)
    pe = pe.at[:, 0::2].set(jnp.sin(pos * div))
    pe = pe.at[:, 1::2].set(jnp.cos(pos * div))
    return pe


def init_params(key, cfg):
    d_model, d_ff = cfg["d_model"], cfg["d_ff"]
    keys = jax.random.split(key, 2 + 2 * cfg["N_encoder"] + 3 * cfg["N_decoder"])
    it = iter(keys)
    params = {
        "src_pos_embed": {"emb": _xavier(next(it), cfg["vocab_size"], d_model),
                          "pe": make_pe(d_model)},
        "tgt_pos_embed": {"emb": _xavier(next(it), sum(cfg["classes"]) + 2, d_model),
                          "pe": make_pe(d_model)},
    }
    enc_layers = []
    for _ in range(cfg["N_encoder"]):
        enc_layers.append({"mha": init_mha(next(it), d_model), "res1": init_norm(d_model),
                           "ff": init_ff(next(it), d_model, d_ff), "res2": init_norm(d_model)})
    params["encoder"] = {"layers": enc_layers, "norm": init_norm(d_model)}
    dec_layers = []
    for _ in range(cfg["N_decoder"]):
        dec_layers.append({"self_mha": init_mha(next(it), d_model), "res_self": init_norm(d_model),
                           "cross_mha": init_mha(next(it), d_model), "res_cross": init_norm(d_model),
                           "ff": init_ff(next(it), d_model, d_ff), "res_ff": init_norm(d_model)})
    params["decoder"] = {"layers": dec_layers, "norm": init_norm(d_model)}
    return params


# --------------------- one-time parameter preparation ------------------------
# Fuse QKV weights, fold 1/sqrt(d_k) into the Q projection, reshape biases and
# LayerNorm params to (1, D) row vectors expected by the fused kernels.

def prepare_params(params, cfg):
    d_model, h = cfg["d_model"], cfg["h"]
    scale = 1.0 / math.sqrt(d_model // h)

    def prep_self(mha, norm):
        return {
            "wqkv": jnp.concatenate([mha["wq"] * scale, mha["wk"], mha["wv"]], axis=1),
            "bqkv": jnp.concatenate([mha["bq"] * scale, mha["bk"], mha["bv"]])[None, :],
            "wo": mha["wo"], "bo": mha["bo"][None, :],
            "gamma": norm["gamma"][None, :], "beta": norm["beta"][None, :],
        }

    def prep_cross(mha, norm):
        return {
            "wq": mha["wq"] * scale, "bq": (mha["bq"] * scale)[None, :],
            "wkv": jnp.concatenate([mha["wk"], mha["wv"]], axis=1),
            "bkv": jnp.concatenate([mha["bk"], mha["bv"]])[None, :],
            "wo": mha["wo"], "bo": mha["bo"][None, :],
            "gamma": norm["gamma"][None, :], "beta": norm["beta"][None, :],
        }

    def prep_ff(ff, norm):
        return {"w1": ff["w1"], "b1": ff["b1"][None, :],
                "w2": ff["w2"], "b2": ff["b2"][None, :],
                "gamma": norm["gamma"][None, :], "beta": norm["beta"][None, :]}

    def prep_norm(norm):
        return {"gamma": norm["gamma"][None, :], "beta": norm["beta"][None, :]}

    prep = {"src_pos_embed": params["src_pos_embed"],
            "tgt_pos_embed": params["tgt_pos_embed"]}

    enc_layers = []
    for layer in params["encoder"]["layers"]:
        enc_layers.append({"mha": prep_self(layer["mha"], layer["res1"]),
                           "ff": prep_ff(layer["ff"], layer["res2"])})
    prep["encoder"] = {"layers": enc_layers,
                       "norm": prep_norm(params["encoder"]["norm"])}

    dec_layers = []
    for layer in params["decoder"]["layers"]:
        entry = {"cross_mha": prep_cross(layer["cross_mha"], layer["res_cross"]),
                 "ff": prep_ff(layer["ff"], layer["res_ff"])}
        if cfg["decoder_self_attn"]:
            entry["self_mha"] = prep_self(layer["self_mha"], layer["res_self"])
        dec_layers.append(entry)
    prep["decoder"] = {"layers": dec_layers,
                       "norm": prep_norm(params["decoder"]["norm"])}
    return prep


# ---------------------------------- main ------------------------------------

if __name__ == "__main__":
    cfg = dict(vocab_size=30, classes=[5, 7], d_model=32, d_ff=64, h=4,
               N_encoder=2, N_decoder=1, decoder_self_attn=True)

    key = jax.random.PRNGKey(0)
    kp, ks, kt = jax.random.split(key, 3)
    params = init_params(kp, cfg)
    prep = prepare_params(params, cfg)

    B, S_src, S_tgt = 2, 8, 8
    src = jax.random.randint(ks, (B, S_src), 1, cfg["vocab_size"], dtype=jnp.int32)
    src = src.at[0, -1].set(PAD)  # exercise the src padding mask
    tgt = jax.random.randint(kt, (B, S_tgt), 0, sum(cfg["classes"]) + 2, dtype=jnp.int32)

    fwd = jax.jit(functools.partial(encoder_decoder_forward, cfg=cfg))
    out = fwd(prep, src, tgt)
    out = jax.block_until_ready(out)

    assert out.shape == (B, S_tgt, cfg["d_model"]) and out.dtype == jnp.float32
    assert bool(jnp.all(jnp.isfinite(out)))
    print("KERNEL_OK")
</pallas_src>

<mosaic_0001>
module attributes {stable_mosaic.version = 11 : i64} {
  func.func @_layernorm_kernel(%arg0: i32, %arg1: memref<16x32xf32, #tpu.memory_space<vmem>>, %arg2: memref<1x32xf32, #tpu.memory_space<vmem>>, %arg3: memref<1x32xf32, #tpu.memory_space<vmem>>, %arg4: memref<16x32xf32, #tpu.memory_space<vmem>>) attributes {dimension_semantics = [#tpu.dimension_semantics<arbitrary>], iteration_bounds = array<i64: 1>, scalar_prefetch = 0 : i64, scratch_operands = 0 : i64, tpu.core_type = #tpu.core_type<tc>, window_params = [{pipeline_mode = #tpu.pipeline_mode<synchronous>, transform_indices = @transform_0, window_bounds = array<i64: 16, 32>}, {pipeline_mode = #tpu.pipeline_mode<synchronous>, transform_indices = @transform_1, window_bounds = array<i64: 1, 32>}, {pipeline_mode = #tpu.pipeline_mode<synchronous>, transform_indices = @transform_2, window_bounds = array<i64: 1, 32>}, {pipeline_mode = #tpu.pipeline_mode<synchronous>, transform_indices = @transform_3, window_bounds = array<i64: 16, 32>}]} {
    %c0 = arith.constant 0 : index
    %c0_0 = arith.constant 0 : index
    %0 = vector.load %arg1[%c0, %c0_0] : memref<16x32xf32, #tpu.memory_space<vmem>>, vector<16x32xf32>
    %c0_1 = arith.constant 0 : index
    %c0_2 = arith.constant 0 : index
    %1 = vector.load %arg2[%c0_1, %c0_2] : memref<1x32xf32, #tpu.memory_space<vmem>>, vector<1x32xf32>
    %c0_3 = arith.constant 0 : index
    %c0_4 = arith.constant 0 : index
    %2 = vector.load %arg3[%c0_3, %c0_4] : memref<1x32xf32, #tpu.memory_space<vmem>>, vector<1x32xf32>
    %cst = arith.constant dense<0.000000e+00> : vector<16xf32>
    %3 = vector.multi_reduction <add>, %0, %cst [1] : vector<16x32xf32> to vector<16xf32>
    %4 = vector.shape_cast %3 : vector<16xf32> to vector<16x1xf32>
    %cst_5 = arith.constant 3.200000e+01 : f32
    %5 = vector.broadcast %cst_5 : f32 to vector<16x1xf32>
    %6 = arith.divf %4, %5 : vector<16x1xf32>
    %7 = vector.broadcast %6 : vector<16x1xf32> to vector<16x32xf32>
    %8 = arith.subf %0, %7 : vector<16x32xf32>
    %9 = arith.mulf %8, %8 : vector<16x32xf32>
    %cst_6 = arith.constant dense<0.000000e+00> : vector<16xf32>
    %10 = vector.multi_reduction <add>, %9, %cst_6 [1] : vector<16x32xf32> to vector<16xf32>
    %11 = vector.shape_cast %10 : vector<16xf32> to vector<16x1xf32>
    %cst_7 = arith.constant 3.200000e+01 : f32
    %12 = vector.broadcast %cst_7 : f32 to vector<16x1xf32>
    %13 = arith.divf %11, %12 : vector<16x1xf32>
    %cst_8 = arith.constant 9.99999974E-6 : f32
    %14 = vector.broadcast %cst_8 : f32 to vector<16x1xf32>
    %15 = arith.addf %13, %14 : vector<16x1xf32>
    %16 = math.rsqrt %15 : vector<16x1xf32>
    %17 = vector.broadcast %16 : vector<16x1xf32> to vector<16x32xf32>
    %18 = arith.mulf %8, %17 : vector<16x32xf32>
    %19 = vector.broadcast %1 : vector<1x32xf32> to vector<16x32xf32>
    %20 = arith.mulf %18, %19 : vector<16x32xf32>
    %21 = vector.broadcast %2 : vector<1x32xf32> to vector<16x32xf32>
    %22 = arith.addf %20, %21 : vector<16x32xf32>
    %c0_9 = arith.constant 0 : index
    %c0_10 = arith.constant 0 : index
    %23 = vector.load %arg4[%c0_9, %c0_10] : memref<16x32xf32, #tpu.memory_space<vmem>>, vector<16x32xf32>
    tpu.vector_store %arg4[%c0_9, %c0_10], %22 {strides = array<i32>} : memref<16x32xf32, #tpu.memory_space<vmem>>, vector<16x32xf32>,
    return
  }
  func.func @transform_0(%arg0: i32) -> (i32, i32) {
    %c0_i32 = arith.constant 0 : i32
    %c0_i32_0 = arith.constant 0 : i32
    %c0_i32_1 = arith.constant 0 : i32
    return %c0_i32, %c0_i32_0 : i32, i32
  }
  func.func @transform_1(%arg0: i32) -> (i32, i32) {
    %c0_i32 = arith.constant 0 : i32
    %c0_i32_0 = arith.constant 0 : i32
    %c0_i32_1 = arith.constant 0 : i32
    return %c0_i32, %c0_i32_0 : i32, i32
  }
  func.func @transform_2(%arg0: i32) -> (i32, i32) {
    %c0_i32 = arith.constant 0 : i32
    %c0_i32_0 = arith.constant 0 : i32
    %c0_i32_1 = arith.constant 0 : i32
    return %c0_i32, %c0_i32_0 : i32, i32
  }
  func.func @transform_3(%arg0: i32) -> (i32, i32) {
    %c0_i32 = arith.constant 0 : i32
    %c0_i32_0 = arith.constant 0 : i32
    %c0_i32_1 = arith.constant 0 : i32
    return %c0_i32, %c0_i32_0 : i32, i32
  }
}

module attributes {stable_mosaic.version = 11 : i64} {
  func.func @_ffn_sublayer_kernel(%arg0: i32, %arg1: memref<16x32xf32, #tpu.memory_space<vmem>>, %arg2: memref<32x64xf32, #tpu.memory_space<vmem>>, %arg3: memref<1x64xf32, #tpu.memory_space<vmem>>, %arg4: memref<64x32xf32, #tpu.memory_space<vmem>>, %arg5: memref<1x32xf32, #tpu.memory_space<vmem>>, %arg6: memref<1x32xf32, #tpu.memory_space<vmem>>, %arg7: memref<1x32xf32, #tpu.memory_space<vmem>>, %arg8: memref<16x32xf32, #tpu.memory_space<vmem>>) attributes {dimension_semantics = [#tpu.dimension_semantics<arbitrary>], iteration_bounds = array<i64: 1>, scalar_prefetch = 0 : i64, scratch_operands = 0 : i64, tpu.core_type = #tpu.core_type<tc>, window_params = [{pipeline_mode = #tpu.pipeline_mode<synchronous>, transform_indices = @transform_0, window_bounds = array<i64: 16, 32>}, {pipeline_mode = #tpu.pipeline_mode<synchronous>, transform_indices = @transform_1, window_bounds = array<i64: 32, 64>}, {pipeline_mode = #tpu.pipeline_mode<synchronous>, transform_indices = @transform_2, window_bounds = array<i64: 1, 64>}, {pipeline_mode = #tpu.pipeline_mode<synchronous>, transform_indices = @transform_3, window_bounds = array<i64: 64, 32>}, {pipeline_mode = #tpu.pipeline_mode<synchronous>, transform_indices = @transform_4, window_bounds = array<i64: 1, 32>}, {pipeline_mode = #tpu.pipeline_mode<synchronous>, transform_indices = @transform_5, window_bounds = array<i64: 1, 32>}, {pipeline_mode = #tpu.pipeline_mode<synchronous>, transform_indices = @transform_6, window_bounds = array<i64: 1, 32>}, {pipeline_mode = #tpu.pipeline_mode<synchronous>, transform_indices = @transform_7, window_bounds = array<i64: 16, 32>}]} {
    %c0 = arith.constant 0 : index
    %c0_0 = arith.constant 0 : index
    %0 = vector.load %arg1[%c0, %c0_0] : memref<16x32xf32, #tpu.memory_space<vmem>>, vector<16x32xf32>
    %c0_1 = arith.constant 0 : index
    %c0_2 = arith.constant 0 : index
    %1 = vector.load %arg6[%c0_1, %c0_2] : memref<1x32xf32, #tpu.memory_space<vmem>>, vector<1x32xf32>
    %c0_3 = arith.constant 0 : index
    %c0_4 = arith.constant 0 : index
    %2 = vector.load %arg7[%c0_3, %c0_4] : memref<1x32xf32, #tpu.memory_space<vmem>>, vector<1x32xf32>
    %cst = arith.constant dense<0.000000e+00> : vector<16xf32>
    %3 = vector.multi_reduction <add>, %0, %cst [1] : vector<16x32xf32> to vector<16xf32>
    %4 = vector.shape_cast %3 : vector<16xf32> to vector<16x1xf32>
    %cst_5 = arith.constant 3.200000e+01 : f32
    %5 = vector.broadcast %cst_5 : f32 to vector<16x1xf32>
    %6 = arith.divf %4, %5 : vector<16x1xf32>
    %7 = vector.broadcast %6 : vector<16x1xf32> to vector<16x32xf32>
    %8 = arith.subf %0, %7 : vector<16x32xf32>
    %9 = arith.mulf %8, %8 : vector<16x32xf32>
    %cst_6 = arith.constant dense<0.000000e+00> : vector<16xf32>
    %10 = vector.multi_reduction <add>, %9, %cst_6 [1] : vector<16x32xf32> to vector<16xf32>
    %11 = vector.shape_cast %10 : vector<16xf32> to vector<16x1xf32>
    %cst_7 = arith.constant 3.200000e+01 : f32
    %12 = vector.broadcast %cst_7 : f32 to vector<16x1xf32>
    %13 = arith.divf %11, %12 : vector<16x1xf32>
    %cst_8 = arith.constant 9.99999974E-6 : f32
    %14 = vector.broadcast %cst_8 : f32 to vector<16x1xf32>
    %15 = arith.addf %13, %14 : vector<16x1xf32>
    %16 = math.rsqrt %15 : vector<16x1xf32>
    %17 = vector.broadcast %16 : vector<16x1xf32> to vector<16x32xf32>
    %18 = arith.mulf %8, %17 : vector<16x32xf32>
    %19 = vector.broadcast %1 : vector<1x32xf32> to vector<16x32xf32>
    %20 = arith.mulf %18, %19 : vector<16x32xf32>
    %21 = vector.broadcast %2 : vector<1x32xf32> to vector<16x32xf32>
    %22 = arith.addf %20, %21 : vector<16x32xf32>
    %c0_9 = arith.constant 0 : index
    %c0_10 = arith.constant 0 : index
    %23 = vector.load %arg2[%c0_9, %c0_10] : memref<32x64xf32, #tpu.memory_space<vmem>>, vector<32x64xf32>
    %cst_11 = arith.constant dense<0.000000e+00> : vector<16x64xf32>
    %24 = tpu.matmul %22, %23, %cst_11 {dimension_numbers = #tpu.dot_dimension_numbers<[1], [0], [0], [1], [0, 0, 1, 1], [], []>} : vector<16x32xf32>, vector<32x64xf32>, vector<16x64xf32> -> vector<16x64xf32>
    %c0_12 = arith.constant 0 : index
    %c0_13 = arith.constant 0 : index
    %25 = vector.load %arg3[%c0_12, %c0_13] : memref<1x64xf32, #tpu.memory_space<vmem>>, vector<1x64xf32>
    %26 = vector.broadcast %25 : vector<1x64xf32> to vector<16x64xf32>
    %27 = arith.addf %24, %26 : vector<16x64xf32>
    %cst_14 = arith.constant 0.000000e+00 : f32
    %28 = vector.broadcast %cst_14 : f32 to vector<16x64xf32>
    %29 = arith.maximumf %27, %28 : vector<16x64xf32>
    %c0_15 = arith.constant 0 : index
    %c0_16 = arith.constant 0 : index
    %30 = vector.load %arg4[%c0_15, %c0_16] : memref<64x32xf32, #tpu.memory_space<vmem>>, vector<64x32xf32>
    %cst_17 = arith.constant dense<0.000000e+00> : vector<16x32xf32>
    %31 = tpu.matmul %29, %30, %cst_17 {dimension_numbers = #tpu.dot_dimension_numbers<[1], [0], [0], [1], [0, 0, 1, 1], [], []>} : vector<16x64xf32>, vector<64x32xf32>, vector<16x32xf32> -> vector<16x32xf32>
    %32 = arith.addf %0, %31 : vector<16x32xf32>
    %c0_18 = arith.constant 0 : index
    %c0_19 = arith.constant 0 : index
    %33 = vector.load %arg5[%c0_18, %c0_19] : memref<1x32xf32, #tpu.memory_space<vmem>>, vector<1x32xf32>
    %34 = vector.broadcast %33 : vector<1x32xf32> to vector<16x32xf32>
    %35 = arith.addf %32, %34 : vector<16x32xf32>
    %c0_20 = arith.constant 0 : index
    %c0_21 = arith.constant 0 : index
    %36 = vector.load %arg8[%c0_20, %c0_21] : memref<16x32xf32, #tpu.memory_space<vmem>>, vector<16x32xf32>
    tpu.vector_store %arg8[%c0_20, %c0_21], %35 {strides = array<i32>} : memref<16x32xf32, #tpu.memory_space<vmem>>, vector<16x32xf32>,
    return
  }
  func.func @transform_0(%arg0: i32) -> (i32, i32) {
    %c0_i32 = arith.constant 0 : i32
    %c0_i32_0 = arith.constant 0 : i32
    %c0_i32_1 = arith.constant 0 : i32
    return %c0_i32, %c0_i32_0 : i32, i32
  }
  func.func @transform_1(%arg0: i32) -> (i32, i32) {
    %c0_i32 = arith.constant 0 : i32
    %c0_i32_0 = arith.constant 0 : i32
    %c0_i32_1 = arith.constant 0 : i32
    return %c0_i32, %c0_i32_0 : i32, i32
  }
  func.func @transform_2(%arg0: i32) -> (i32, i32) {
    %c0_i32 = arith.constant 0 : i32
    %c0_i32_0 = arith.constant 0 : i32
    %c0_i32_1 = arith.constant 0 : i32
    return %c0_i32, %c0_i32_0 : i32, i32
  }
  func.func @transform_3(%arg0: i32) -> (i32, i32) {
    %c0_i32 = arith.constant 0 : i32
    %c0_i32_0 = arith.constant 0 : i32
    %c0_i32_1 = arith.constant 0 : i32
    return %c0_i32, %c0_i32_0 : i32, i32
  }
  func.func @transform_4(%arg0: i32) -> (i32, i32) {
    %c0_i32 = arith.constant 0 : i32
    %c0_i32_0 = arith.constant 0 : i32
    %c0_i32_1 = arith.constant 0 : i32
    return %c0_i32, %c0_i32_0 : i32, i32
  }
  func.func @transform_5(%arg0: i32) -> (i32, i32) {
    %c0_i32 = arith.constant 0 : i32
    %c0_i32_0 = arith.constant 0 : i32
    %c0_i32_1 = arith.constant 0 : i32
    return %c0_i32, %c0_i32_0 : i32, i32
  }
  func.func @transform_6(%arg0: i32) -> (i32, i32) {
    %c0_i32 = arith.constant 0 : i32
    %c0_i32_0 = arith.constant 0 : i32
    %c0_i32_1 = arith.constant 0 : i32
    return %c0_i32, %c0_i32_0 : i32, i32
  }
  func.func @transform_7(%arg0: i32) -> (i32, i32) {
    %c0_i32 = arith.constant 0 : i32
    %c0_i32_0 = arith.constant 0 : i32
    %c0_i32_1 = arith.constant 0 : i32
    return %c0_i32, %c0_i32_0 : i32, i32
  }
}

module attributes {stable_mosaic.version = 11 : i64} {
  func.func @kernel(%arg0: i32, %arg1: memref<1x8x32xf32, #tpu.memory_space<vmem>>, %arg2: memref<32x96xf32, #tpu.memory_space<vmem>>, %arg3: memref<1x96xf32, #tpu.memory_space<vmem>>, %arg4: memref<32x32xf32, #tpu.memory_space<vmem>>, %arg5: memref<1x32xf32, #tpu.memory_space<vmem>>, %arg6: memref<1x32xf32, #tpu.memory_space<vmem>>, %arg7: memref<1x32xf32, #tpu.memory_space<vmem>>, %arg8: memref<1x1x8xf32, #tpu.memory_space<vmem>>, %arg9: memref<1x8x32xf32, #tpu.memory_space<vmem>>) attributes {dimension_semantics = [#tpu.dimension_semantics<parallel>], iteration_bounds = array<i64: 2>, scalar_prefetch = 0 : i64, scratch_operands = 0 : i64, tpu.core_type = #tpu.core_type<tc>, window_params = [{transform_indices = @transform_0, window_bounds = array<i64: 1, 8, 32>}, {pipeline_mode = #tpu.pipeline_mode<synchronous>, transform_indices = @transform_1, window_bounds = array<i64: 32, 96>}, {pipeline_mode = #tpu.pipeline_mode<synchronous>, transform_indices = @transform_2, window_bounds = array<i64: 1, 96>}, {pipeline_mode = #tpu.pipeline_mode<synchronous>, transform_indices = @transform_3, window_bounds = array<i64: 32, 32>}, {pipeline_mode = #tpu.pipeline_mode<synchronous>, transform_indices = @transform_4, window_bounds = array<i64: 1, 32>}, {pipeline_mode = #tpu.pipeline_mode<synchronous>, transform_indices = @transform_5, window_bounds = array<i64: 1, 32>}, {pipeline_mode = #tpu.pipeline_mode<synchronous>, transform_indices = @transform_6, window_bounds = array<i64: 1, 32>}, {transform_indices = @transform_7, window_bounds = array<i64: 1, 1, 8>}, {transform_indices = @transform_8, window_bounds = array<i64: 1, 8, 32>}]} {
    %c0 = arith.constant 0 : index
    %c0_0 = arith.constant 0 : index
    %c0_1 = arith.constant 0 : index
    %0 = vector.load %arg1[%c0, %c0_0, %c0_1] : memref<1x8x32xf32, #tpu.memory_space<vmem>>, vector<1x8x32xf32>
    %1 = vector.shape_cast %0 : vector<1x8x32xf32> to vector<8x32xf32>
    %c0_2 = arith.constant 0 : index
    %c0_3 = arith.constant 0 : index
    %2 = vector.load %arg6[%c0_2, %c0_3] : memref<1x32xf32, #tpu.memory_space<vmem>>, vector<1x32xf32>
    %c0_4 = arith.constant 0 : index
    %c0_5 = arith.constant 0 : index
    %3 = vector.load %arg7[%c0_4, %c0_5] : memref<1x32xf32, #tpu.memory_space<vmem>>, vector<1x32xf32>
    %cst = arith.constant dense<0.000000e+00> : vector<8xf32>
    %4 = vector.multi_reduction <add>, %1, %cst [1] : vector<8x32xf32> to vector<8xf32>
    %5 = vector.shape_cast %4 : vector<8xf32> to vector<8x1xf32>
    %cst_6 = arith.constant 3.200000e+01 : f32
    %6 = vector.broadcast %cst_6 : f32 to vector<8x1xf32>
    %7 = arith.divf %5, %6 : vector<8x1xf32>
    %8 = vector.broadcast %7 : vector<8x1xf32> to vector<8x32xf32>
    %9 = arith.subf %1, %8 : vector<8x32xf32>
    %10 = arith.mulf %9, %9 : vector<8x32xf32>
    %cst_7 = arith.constant dense<0.000000e+00> : vector<8xf32>
    %11 = vector.multi_reduction <add>, %10, %cst_7 [1] : vector<8x32xf32> to vector<8xf32>
    %12 = vector.shape_cast %11 : vector<8xf32> to vector<8x1xf32>
    %cst_8 = arith.constant 3.200000e+01 : f32
    %13 = vector.broadcast %cst_8 : f32 to vector<8x1xf32>
    %14 = arith.divf %12, %13 : vector<8x1xf32>
    %cst_9 = arith.constant 9.99999974E-6 : f32
    %15 = vector.broadcast %cst_9 : f32 to vector<8x1xf32>
    %16 = arith.addf %14, %15 : vector<8x1xf32>
    %17 = math.rsqrt %16 : vector<8x1xf32>
    %18 = vector.broadcast %17 : vector<8x1xf32> to vector<8x32xf32>
    %19 = arith.mulf %9, %18 : vector<8x32xf32>
    %20 = vector.broadcast %2 : vector<1x32xf32> to vector<8x32xf32>
    %21 = arith.mulf %19, %20 : vector<8x32xf32>
    %22 = vector.broadcast %3 : vector<1x32xf32> to vector<8x32xf32>
    %23 = arith.addf %21, %22 : vector<8x32xf32>
    %c0_10 = arith.constant 0 : index
    %c0_11 = arith.constant 0 : index
    %24 = vector.load %arg2[%c0_10, %c0_11] : memref<32x96xf32, #tpu.memory_space<vmem>>, vector<32x96xf32>
    %cst_12 = arith.constant dense<0.000000e+00> : vector<8x96xf32>
    %25 = tpu.matmul %23, %24, %cst_12 {dimension_numbers = #tpu.dot_dimension_numbers<[1], [0], [0], [1], [0, 0, 1, 1], [], []>} : vector<8x32xf32>, vector<32x96xf32>, vector<8x96xf32> -> vector<8x96xf32>
    %c0_13 = arith.constant 0 : index
    %c0_14 = arith.constant 0 : index
    %26 = vector.load %arg3[%c0_13, %c0_14] : memref<1x96xf32, #tpu.memory_space<vmem>>, vector<1x96xf32>
    %27 = vector.broadcast %26 : vector<1x96xf32> to vector<8x96xf32>
    %28 = arith.addf %25, %27 : vector<8x96xf32>
    %c0_15 = arith.constant 0 : index
    %c0_16 = arith.constant 0 : index
    %c0_17 = arith.constant 0 : index
    %29 = vector.load %arg8[%c0_15, %c0_16, %c0_17] : memref<1x1x8xf32, #tpu.memory_space<vmem>>, vector<1x1x8xf32>
    %30 = vector.shape_cast %29 : vector<1x1x8xf32> to vector<1x8xf32>
    %cst_18 = arith.constant 0.000000e+00 : f32
    %31 = vector.broadcast %cst_18 : f32 to vector<8x32xf32>
    %32 = vector.extract_strided_slice %28 {offsets = [0, 0], sizes = [8, 8], strides = [1, 1]} : vector<8x96xf32> to vector<8x8xf32>
    %33 = vector.extract_strided_slice %28 {offsets = [0, 32], sizes = [8, 8], strides = [1, 1]} : vector<8x96xf32> to vector<8x8xf32>
    %34 = vector.extract_strided_slice %28 {offsets = [0, 64], sizes = [8, 8], strides = [1, 1]} : vector<8x96xf32> to vector<8x8xf32>
    %cst_19 = arith.constant dense<0.000000e+00> : vector<8x8xf32>
    %35 = tpu.matmul %32, %33, %cst_19 {dimension_numbers = #tpu.dot_dimension_numbers<[1], [1], [0], [0], [0, 0, 1, 0], [], []>} : vector<8x8xf32>, vector<8x8xf32>, vector<8x8xf32> -> vector<8x8xf32>
    %36 = vector.broadcast %30 : vector<1x8xf32> to vector<8x8xf32>
    %37 = arith.addf %35, %36 : vector<8x8xf32>
    %cst_20 = arith.constant dense<0xFF800000> : vector<8xf32>
    %38 = vector.multi_reduction <maximumf>, %37, %cst_20 [1] : vector<8x8xf32> to vector<8xf32>
    %39 = vector.shape_cast %38 : vector<8xf32> to vector<8x1xf32>
    %40 = vector.broadcast %39 : vector<8x1xf32> to vector<8x8xf32>
    %41 = arith.subf %37, %40 : vector<8x8xf32>
    %42 = math.exp %41 : vector<8x8xf32>
    %cst_21 = arith.constant dense<0.000000e+00> : vector<8xf32>
    %43 = vector.multi_reduction <add>, %42, %cst_21 [1] : vector<8x8xf32> to vector<8xf32>
    %44 = vector.shape_cast %43 : vector<8xf32> to vector<8x1xf32>
    %45 = tpu.reciprocal %44 {approx = true} : vector<8x1xf32> -> vector<8x1xf32>
    %46 = vector.broadcast %45 : vector<8x1xf32> to vector<8x8xf32>
    %47 = arith.mulf %42, %46 : vector<8x8xf32>
    %cst_22 = arith.constant dense<0.000000e+00> : vector<8x8xf32>
    %48 = tpu.matmul %47, %34, %cst_22 {dimension_numbers = #tpu.dot_dimension_numbers<[1], [0], [0], [1], [0, 0, 1, 1], [], []>} : vector<8x8xf32>, vector<8x8xf32>, vector<8x8xf32> -> vector<8x8xf32>
    %c0_23 = arith.constant 0 : index
    %c0_24 = arith.constant 0 : index
    %49 = vector.load %arg4[%c0_23, %c0_24] : memref<32x32xf32, #tpu.memory_space<vmem>>, vector<8x32xf32>
    %cst_25 = arith.constant dense<0.000000e+00> : vector<8x32xf32>
    %50 = tpu.matmul %48, %49, %cst_25 {dimension_numbers = #tpu.dot_dimension_numbers<[1], [0], [0], [1], [0, 0, 1, 1], [], []>} : vector<8x8xf32>, vector<8x32xf32>, vector<8x32xf32> -> vector<8x32xf32>
    %51 = arith.addf %31, %50 : vector<8x32xf32>
    %52 = vector.extract_strided_slice %28 {offsets = [0, 8], sizes = [8, 8], strides = [1, 1]} : vector<8x96xf32> to vector<8x8xf32>
    %53 = vector.extract_strided_slice %28 {offsets = [0, 40], sizes = [8, 8], strides = [1, 1]} : vector<8x96xf32> to vector<8x8xf32>
    %54 = vector.extract_strided_slice %28 {offsets = [0, 72], sizes = [8, 8], strides = [1, 1]} : vector<8x96xf32> to vector<8x8xf32>
    %cst_26 = arith.constant dense<0.000000e+00> : vector<8x8xf32>
    %55 = tpu.matmul %52, %53, %cst_26 {dimension_numbers = #tpu.dot_dimension_numbers<[1], [1], [0], [0], [0, 0, 1, 0], [], []>} : vector<8x8xf32>, vector<8x8xf32>, vector<8x8xf32> -> vector<8x8xf32>
    %56 = vector.broadcast %30 : vector<1x8xf32> to vector<8x8xf32>
    %57 = arith.addf %55, %56 : vector<8x8xf32>
    %cst_27 = arith.constant dense<0xFF800000> : vector<8xf32>
    %58 = vector.multi_reduction <maximumf>, %57, %cst_27 [1] : vector<8x8xf32> to vector<8xf32>
    %59 = vector.shape_cast %58 : vector<8xf32> to vector<8x1xf32>
    %60 = vector.broadcast %59 : vector<8x1xf32> to vector<8x8xf32>
    %61 = arith.subf %57, %60 : vector<8x8xf32>
    %62 = math.exp %61 : vector<8x8xf32>
    %cst_28 = arith.constant dense<0.000000e+00> : vector<8xf32>
    %63 = vector.multi_reduction <add>, %62, %cst_28 [1] : vector<8x8xf32> to vector<8xf32>
    %64 = vector.shape_cast %63 : vector<8xf32> to vector<8x1xf32>
    %65 = tpu.reciprocal %64 {approx = true} : vector<8x1xf32> -> vector<8x1xf32>
    %66 = vector.broadcast %65 : vector<8x1xf32> to vector<8x8xf32>
    %67 = arith.mulf %62, %66 : vector<8x8xf32>
    %cst_29 = arith.constant dense<0.000000e+00> : vector<8x8xf32>
    %68 = tpu.matmul %67, %54, %cst_29 {dimension_numbers = #tpu.dot_dimension_numbers<[1], [0], [0], [1], [0, 0, 1, 1], [], []>} : vector<8x8xf32>, vector<8x8xf32>, vector<8x8xf32> -> vector<8x8xf32>
    %c8 = arith.constant 8 : index
    %c0_30 = arith.constant 0 : index
    %69 = vector.load %arg4[%c8, %c0_30] : memref<32x32xf32, #tpu.memory_space<vmem>>, vector<8x32xf32>
    %cst_31 = arith.constant dense<0.000000e+00> : vector<8x32xf32>
    %70 = tpu.matmul %68, %69, %cst_31 {dimension_numbers = #tpu.dot_dimension_numbers<[1], [0], [0], [1], [0, 0, 1, 1], [], []>} : vector<8x8xf32>, vector<8x32xf32>, vector<8x32xf32> -> vector<8x32xf32>
    %71 = arith.addf %51, %70 : vector<8x32xf32>
    %72 = vector.extract_strided_slice %28 {offsets = [0, 16], sizes = [8, 8], strides = [1, 1]} : vector<8x96xf32> to vector<8x8xf32>
    %73 = vector.extract_strided_slice %28 {offsets = [0, 48], sizes = [8, 8], strides = [1, 1]} : vector<8x96xf32> to vector<8x8xf32>
    %74 = vector.extract_strided_slice %28 {offsets = [0, 80], sizes = [8, 8], strides = [1, 1]} : vector<8x96xf32> to vector<8x8xf32>
    %cst_32 = arith.constant dense<0.000000e+00> : vector<8x8xf32>
    %75 = tpu.matmul %72, %73, %cst_32 {dimension_numbers = #tpu.dot_dimension_numbers<[1], [1], [0], [0], [0, 0, 1, 0], [], []>} : vector<8x8xf32>, vector<8x8xf32>, vector<8x8xf32> -> vector<8x8xf32>
    %76 = vector.broadcast %30 : vector<1x8xf32> to vector<8x8xf32>
    %77 = arith.addf %75, %76 : vector<8x8xf32>
    %cst_33 = arith.constant dense<0xFF800000> : vector<8xf32>
    %78 = vector.multi_reduction <maximumf>, %77, %cst_33 [1] : vector<8x8xf32> to vector<8xf32>
    %79 = vector.shape_cast %78 : vector<8xf32> to vector<8x1xf32>
    %80 = vector.broadcast %79 : vector<8x1xf32> to vector<8x8xf32>
    %81 = arith.subf %77, %80 : vector<8x8xf32>
    %82 = math.exp %81 : vector<8x8xf32>
    %cst_34 = arith.constant dense<0.000000e+00> : vector<8xf32>
    %83 = vector.multi_reduction <add>, %82, %cst_34 [1] : vector<8x8xf32> to vector<8xf32>
    %84 = vector.shape_cast %83 : vector<8xf32> to vector<8x1xf32>
    %85 = tpu.reciprocal %84 {approx = true} : vector<8x1xf32> -> vector<8x1xf32>
    %86 = vector.broadcast %85 : vector<8x1xf32> to vector<8x8xf32>
    %87 = arith.mulf %82, %86 : vector<8x8xf32>
    %cst_35 = arith.constant dense<0.000000e+00> : vector<8x8xf32>
    %88 = tpu.matmul %87, %74, %cst_35 {dimension_numbers = #tpu.dot_dimension_numbers<[1], [0], [0], [1], [0, 0, 1, 1], [], []>} : vector<8x8xf32>, vector<8x8xf32>, vector<8x8xf32> -> vector<8x8xf32>
    %c16 = arith.constant 16 : index
    %c0_36 = arith.constant 0 : index
    %89 = vector.load %arg4[%c16, %c0_36] : memref<32x32xf32, #tpu.memory_space<vmem>>, vector<8x32xf32>
    %cst_37 = arith.constant dense<0.000000e+00> : vector<8x32xf32>
    %90 = tpu.matmul %88, %89, %cst_37 {dimension_numbers = #tpu.dot_dimension_numbers<[1], [0], [0], [1], [0, 0, 1, 1], [], []>} : vector<8x8xf32>, vector<8x32xf32>, vector<8x32xf32> -> vector<8x32xf32>
    %91 = arith.addf %71, %90 : vector<8x32xf32>
    %92 = vector.extract_strided_slice %28 {offsets = [0, 24], sizes = [8, 8], strides = [1, 1]} : vector<8x96xf32> to vector<8x8xf32>
    %93 = vector.extract_strided_slice %28 {offsets = [0, 56], sizes = [8, 8], strides = [1, 1]} : vector<8x96xf32> to vector<8x8xf32>
    %94 = vector.extract_strided_slice %28 {offsets = [0, 88], sizes = [8, 8], strides = [1, 1]} : vector<8x96xf32> to vector<8x8xf32>
    %cst_38 = arith.constant dense<0.000000e+00> : vector<8x8xf32>
    %95 = tpu.matmul %92, %93, %cst_38 {dimension_numbers = #tpu.dot_dimension_numbers<[1], [1], [0], [0], [0, 0, 1, 0], [], []>} : vector<8x8xf32>, vector<8x8xf32>, vector<8x8xf32> -> vector<8x8xf32>
    %96 = vector.broadcast %30 : vector<1x8xf32> to vector<8x8xf32>
    %97 = arith.addf %95, %96 : vector<8x8xf32>
    %cst_39 = arith.constant dense<0xFF800000> : vector<8xf32>
    %98 = vector.multi_reduction <maximumf>, %97, %cst_39 [1] : vector<8x8xf32> to vector<8xf32>
    %99 = vector.shape_cast %98 : vector<8xf32> to vector<8x1xf32>
    %100 = vector.broadcast %99 : vector<8x1xf32> to vector<8x8xf32>
    %101 = arith.subf %97, %100 : vector<8x8xf32>
    %102 = math.exp %101 : vector<8x8xf32>
    %cst_40 = arith.constant dense<0.000000e+00> : vector<8xf32>
    %103 = vector.multi_reduction <add>, %102, %cst_40 [1] : vector<8x8xf32> to vector<8xf32>
    %104 = vector.shape_cast %103 : vector<8xf32> to vector<8x1xf32>
    %105 = tpu.reciprocal %104 {approx = true} : vector<8x1xf32> -> vector<8x1xf32>
    %106 = vector.broadcast %105 : vector<8x1xf32> to vector<8x8xf32>
    %107 = arith.mulf %102, %106 : vector<8x8xf32>
    %cst_41 = arith.constant dense<0.000000e+00> : vector<8x8xf32>
    %108 = tpu.matmul %107, %94, %cst_41 {dimension_numbers = #tpu.dot_dimension_numbers<[1], [0], [0], [1], [0, 0, 1, 1], [], []>} : vector<8x8xf32>, vector<8x8xf32>, vector<8x8xf32> -> vector<8x8xf32>
    %c24 = arith.constant 24 : index
    %c0_42 = arith.constant 0 : index
    %109 = vector.load %arg4[%c24, %c0_42] : memref<32x32xf32, #tpu.memory_space<vmem>>, vector<8x32xf32>
    %cst_43 = arith.constant dense<0.000000e+00> : vector<8x32xf32>
    %110 = tpu.matmul %108, %109, %cst_43 {dimension_numbers = #tpu.dot_dimension_numbers<[1], [0], [0], [1], [0, 0, 1, 1], [], []>} : vector<8x8xf32>, vector<8x32xf32>, vector<8x32xf32> -> vector<8x32xf32>
    %111 = arith.addf %91, %110 : vector<8x32xf32>
    %112 = arith.addf %1, %111 : vector<8x32xf32>
    %c0_44 = arith.constant 0 : index
    %c0_45 = arith.constant 0 : index
    %113 = vector.load %arg5[%c0_44, %c0_45] : memref<1x32xf32, #tpu.memory_space<vmem>>, vector<1x32xf32>
    %114 = vector.broadcast %113 : vector<1x32xf32> to vector<8x32xf32>
    %115 = arith.addf %112, %114 : vector<8x32xf32>
    %c0_46 = arith.constant 0 : index
    %c0_47 = arith.constant 0 : index
    %c0_48 = arith.constant 0 : index
    %116 = vector.load %arg9[%c0_46, %c0_47, %c0_48] : memref<1x8x32xf32, #tpu.memory_space<vmem>>, vector<1x8x32xf32>
    %117 = vector.shape_cast %116 : vector<1x8x32xf32> to vector<8x32xf32>
    %118 = vector.shape_cast %115 : vector<8x32xf32> to vector<1x8x32xf32>
    tpu.vector_store %arg9[%c0_46, %c0_47, %c0_48], %118 {strides = array<i32>} : memref<1x8x32xf32, #tpu.memory_space<vmem>>, vector<1x8x32xf32>,
    return
  }
  func.func @transform_0(%arg0: i32) -> (i32, i32, i32) {
    %c0_i32 = arith.constant 0 : i32
    %c0_i32_0 = arith.constant 0 : i32
    %c0_i32_1 = arith.constant 0 : i32
    return %arg0, %c0_i32, %c0_i32_0 : i32, i32, i32
  }
  func.func @transform_1(%arg0: i32) -> (i32, i32) {
    %c0_i32 = arith.constant 0 : i32
    %c0_i32_0 = arith.constant 0 : i32
    %c0_i32_1 = arith.constant 0 : i32
    return %c0_i32, %c0_i32_0 : i32, i32
  }
  func.func @transform_2(%arg0: i32) -> (i32, i32) {
    %c0_i32 = arith.constant 0 : i32
    %c0_i32_0 = arith.constant 0 : i32
    %c0_i32_1 = arith.constant 0 : i32
    return %c0_i32, %c0_i32_0 : i32, i32
  }
  func.func @transform_3(%arg0: i32) -> (i32, i32) {
    %c0_i32 = arith.constant 0 : i32
    %c0_i32_0 = arith.constant 0 : i32
    %c0_i32_1 = arith.constant 0 : i32
    return %c0_i32, %c0_i32_0 : i32, i32
  }
  func.func @transform_4(%arg0: i32) -> (i32, i32) {
    %c0_i32 = arith.constant 0 : i32
    %c0_i32_0 = arith.constant 0 : i32
    %c0_i32_1 = arith.constant 0 : i32
    return %c0_i32, %c0_i32_0 : i32, i32
  }
  func.func @transform_5(%arg0: i32) -> (i32, i32) {
    %c0_i32 = arith.constant 0 : i32
    %c0_i32_0 = arith.constant 0 : i32
    %c0_i32_1 = arith.constant 0 : i32
    return %c0_i32, %c0_i32_0 : i32, i32
  }
  func.func @transform_6(%arg0: i32) -> (i32, i32) {
    %c0_i32 = arith.constant 0 : i32
    %c0_i32_0 = arith.constant 0 : i32
    %c0_i32_1 = arith.constant 0 : i32
    return %c0_i32, %c0_i32_0 : i32, i32
  }
  func.func @transform_7(%arg0: i32) -> (i32, i32, i32) {
    %c0_i32 = arith.constant 0 : i32
    %c0_i32_0 = arith.constant 0 : i32
    %c0_i32_1 = arith.constant 0 : i32
    return %arg0, %c0_i32, %c0_i32_0 : i32, i32, i32
  }
  func.func @transform_8(%arg0: i32) -> (i32, i32, i32) {
    %c0_i32 = arith.constant 0 : i32
    %c0_i32_0 = arith.constant 0 : i32
    %c0_i32_1 = arith.constant 0 : i32
    return %arg0, %c0_i32, %c0_i32_0 : i32, i32, i32
  }
}

module attributes {stable_mosaic.version = 11 : i64} {
  func.func @kernel(%arg0: i32, %arg1: memref<1x8x32xf32, #tpu.memory_space<vmem>>, %arg2: memref<1x8x32xf32, #tpu.memory_space<vmem>>, %arg3: memref<32x32xf32, #tpu.memory_space<vmem>>, %arg4: memref<1x32xf32, #tpu.memory_space<vmem>>, %arg5: memref<32x64xf32, #tpu.memory_space<vmem>>, %arg6: memref<1x64xf32, #tpu.memory_space<vmem>>, %arg7: memref<32x32xf32, #tpu.memory_space<vmem>>, %arg8: memref<1x32xf32, #tpu.memory_space<vmem>>, %arg9: memref<1x32xf32, #tpu.memory_space<vmem>>, %arg10: memref<1x32xf32, #tpu.memory_space<vmem>>, %arg11: memref<1x1x8xf32, #tpu.memory_space<vmem>>, %arg12: memref<1x8x32xf32, #tpu.memory_space<vmem>>) attributes {dimension_semantics = [#tpu.dimension_semantics<parallel>], iteration_bounds = array<i64: 2>, scalar_prefetch = 0 : i64, scratch_operands = 0 : i64, tpu.core_type = #tpu.core_type<tc>, window_params = [{transform_indices = @transform_0, window_bounds = array<i64: 1, 8, 32>}, {transform_indices = @transform_1, window_bounds = array<i64: 1, 8, 32>}, {pipeline_mode = #tpu.pipeline_mode<synchronous>, transform_indices = @transform_2, window_bounds = array<i64: 32, 32>}, {pipeline_mode = #tpu.pipeline_mode<synchronous>, transform_indices = @transform_3, window_bounds = array<i64: 1, 32>}, {pipeline_mode = #tpu.pipeline_mode<synchronous>, transform_indices = @transform_4, window_bounds = array<i64: 32, 64>}, {pipeline_mode = #tpu.pipeline_mode<synchronous>, transform_indices = @transform_5, window_bounds = array<i64: 1, 64>}, {pipeline_mode = #tpu.pipeline_mode<synchronous>, transform_indices = @transform_6, window_bounds = array<i64: 32, 32>}, {pipeline_mode = #tpu.pipeline_mode<synchronous>, transform_indices = @transform_7, window_bounds = array<i64: 1, 32>}, {pipeline_mode = #tpu.pipeline_mode<synchronous>, transform_indices = @transform_8, window_bounds = array<i64: 1, 32>}, {pipeline_mode = #tpu.pipeline_mode<synchronous>, transform_indices = @transform_9, window_bounds = array<i64: 1, 32>}, {transform_indices = @transform_10, window_bounds = array<i64: 1, 1, 8>}, {transform_indices = @transform_11, window_bounds = array<i64: 1, 8, 32>}]} {
    %c0 = arith.constant 0 : index
    %c0_0 = arith.constant 0 : index
    %c0_1 = arith.constant 0 : index
    %0 = vector.load %arg1[%c0, %c0_0, %c0_1] : memref<1x8x32xf32, #tpu.memory_space<vmem>>, vector<1x8x32xf32>
    %1 = vector.shape_cast %0 : vector<1x8x32xf32> to vector<8x32xf32>
    %c0_2 = arith.constant 0 : index
    %c0_3 = arith.constant 0 : index
    %2 = vector.load %arg9[%c0_2, %c0_3] : memref<1x32xf32, #tpu.memory_space<vmem>>, vector<1x32xf32>
    %c0_4 = arith.constant 0 : index
    %c0_5 = arith.constant 0 : index
    %3 = vector.load %arg10[%c0_4, %c0_5] : memref<1x32xf32, #tpu.memory_space<vmem>>, vector<1x32xf32>
    %cst = arith.constant dense<0.000000e+00> : vector<8xf32>
    %4 = vector.multi_reduction <add>, %1, %cst [1] : vector<8x32xf32> to vector<8xf32>
    %5 = vector.shape_cast %4 : vector<8xf32> to vector<8x1xf32>
    %cst_6 = arith.constant 3.200000e+01 : f32
    %6 = vector.broadcast %cst_6 : f32 to vector<8x1xf32>
    %7 = arith.divf %5, %6 : vector<8x1xf32>
    %8 = vector.broadcast %7 : vector<8x1xf32> to vector<8x32xf32>
    %9 = arith.subf %1, %8 : vector<8x32xf32>
    %10 = arith.mulf %9, %9 : vector<8x32xf32>
    %cst_7 = arith.constant dense<0.000000e+00> : vector<8xf32>
    %11 = vector.multi_reduction <add>, %10, %cst_7 [1] : vector<8x32xf32> to vector<8xf32>
    %12 = vector.shape_cast %11 : vector<8xf32> to vector<8x1xf32>
    %cst_8 = arith.constant 3.200000e+01 : f32
    %13 = vector.broadcast %cst_8 : f32 to vector<8x1xf32>
    %14 = arith.divf %12, %13 : vector<8x1xf32>
    %cst_9 = arith.constant 9.99999974E-6 : f32
    %15 = vector.broadcast %cst_9 : f32 to vector<8x1xf32>
    %16 = arith.addf %14, %15 : vector<8x1xf32>
    %17 = math.rsqrt %16 : vector<8x1xf32>
    %18 = vector.broadcast %17 : vector<8x1xf32> to vector<8x32xf32>
    %19 = arith.mulf %9, %18 : vector<8x32xf32>
    %20 = vector.broadcast %2 : vector<1x32xf32> to vector<8x32xf32>
    %21 = arith.mulf %19, %20 : vector<8x32xf32>
    %22 = vector.broadcast %3 : vector<1x32xf32> to vector<8x32xf32>
    %23 = arith.addf %21, %22 : vector<8x32xf32>
    %c0_10 = arith.constant 0 : index
    %c0_11 = arith.constant 0 : index
    %24 = vector.load %arg3[%c0_10, %c0_11] : memref<32x32xf32, #tpu.memory_space<vmem>>, vector<32x32xf32>
    %cst_12 = arith.constant dense<0.000000e+00> : vector<8x32xf32>
    %25 = tpu.matmul %23, %24, %cst_12 {dimension_numbers = #tpu.dot_dimension_numbers<[1], [0], [0], [1], [0, 0, 1, 1], [], []>} : vector<8x32xf32>, vector<32x32xf32>, vector<8x32xf32> -> vector<8x32xf32>
    %c0_13 = arith.constant 0 : index
    %c0_14 = arith.constant 0 : index
    %26 = vector.load %arg4[%c0_13, %c0_14] : memref<1x32xf32, #tpu.memory_space<vmem>>, vector<1x32xf32>
    %27 = vector.broadcast %26 : vector<1x32xf32> to vector<8x32xf32>
    %28 = arith.addf %25, %27 : vector<8x32xf32>
    %c0_15 = arith.constant 0 : index
    %c0_16 = arith.constant 0 : index
    %c0_17 = arith.constant 0 : index
    %29 = vector.load %arg2[%c0_15, %c0_16, %c0_17] : memref<1x8x32xf32, #tpu.memory_space<vmem>>, vector<1x8x32xf32>
    %30 = vector.shape_cast %29 : vector<1x8x32xf32> to vector<8x32xf32>
    %c0_18 = arith.constant 0 : index
    %c0_19 = arith.constant 0 : index
    %31 = vector.load %arg5[%c0_18, %c0_19] : memref<32x64xf32, #tpu.memory_space<vmem>>, vector<32x64xf32>
    %cst_20 = arith.constant dense<0.000000e+00> : vector<8x64xf32>
    %32 = tpu.matmul %30, %31, %cst_20 {dimension_numbers = #tpu.dot_dimension_numbers<[1], [0], [0], [1], [0, 0, 1, 1], [], []>} : vector<8x32xf32>, vector<32x64xf32>, vector<8x64xf32> -> vector<8x64xf32>
    %c0_21 = arith.constant 0 : index
    %c0_22 = arith.constant 0 : index
    %33 = vector.load %arg6[%c0_21, %c0_22] : memref<1x64xf32, #tpu.memory_space<vmem>>, vector<1x64xf32>
    %34 = vector.broadcast %33 : vector<1x64xf32> to vector<8x64xf32>
    %35 = arith.addf %32, %34 : vector<8x64xf32>
    %c0_23 = arith.constant 0 : index
    %c0_24 = arith.constant 0 : index
    %c0_25 = arith.constant 0 : index
    %36 = vector.load %arg11[%c0_23, %c0_24, %c0_25] : memref<1x1x8xf32, #tpu.memory_space<vmem>>, vector<1x1x8xf32>
    %37 = vector.shape_cast %36 : vector<1x1x8xf32> to vector<1x8xf32>
    %cst_26 = arith.constant 0.000000e+00 : f32
    %38 = vector.broadcast %cst_26 : f32 to vector<8x32xf32>
    %39 = vector.extract_strided_slice %28 {offsets = [0, 0], sizes = [8, 8], strides = [1, 1]} : vector<8x32xf32> to vector<8x8xf32>
    %40 = vector.extract_strided_slice %35 {offsets = [0, 0], sizes = [8, 8], strides = [1, 1]} : vector<8x64xf32> to vector<8x8xf32>
    %41 = vector.extract_strided_slice %35 {offsets = [0, 32], sizes = [8, 8], strides = [1, 1]} : vector<8x64xf32> to vector<8x8xf32>
    %cst_27 = arith.constant dense<0.000000e+00> : vector<8x8xf32>
    %42 = tpu.matmul %39, %40, %cst_27 {dimension_numbers = #tpu.dot_dimension_numbers<[1], [1], [0], [0], [0, 0, 1, 0], [], []>} : vector<8x8xf32>, vector<8x8xf32>, vector<8x8xf32> -> vector<8x8xf32>
    %43 = vector.broadcast %37 : vector<1x8xf32> to vector<8x8xf32>
    %44 = arith.addf %42, %43 : vector<8x8xf32>
    %cst_28 = arith.constant dense<0xFF800000> : vector<8xf32>
    %45 = vector.multi_reduction <maximumf>, %44, %cst_28 [1] : vector<8x8xf32> to vector<8xf32>
    %46 = vector.shape_cast %45 : vector<8xf32> to vector<8x1xf32>
    %47 = vector.broadcast %46 : vector<8x1xf32> to vector<8x8xf32>
    %48 = arith.subf %44, %47 : vector<8x8xf32>
    %49 = math.exp %48 : vector<8x8xf32>
    %cst_29 = arith.constant dense<0.000000e+00> : vector<8xf32>
    %50 = vector.multi_reduction <add>, %49, %cst_29 [1] : vector<8x8xf32> to vector<8xf32>
    %51 = vector.shape_cast %50 : vector<8xf32> to vector<8x1xf32>
    %52 = tpu.reciprocal %51 {approx = true} : vector<8x1xf32> -> vector<8x1xf32>
    %53 = vector.broadcast %52 : vector<8x1xf32> to vector<8x8xf32>
    %54 = arith.mulf %49, %53 : vector<8x8xf32>
    %cst_30 = arith.constant dense<0.000000e+00> : vector<8x8xf32>
    %55 = tpu.matmul %54, %41, %cst_30 {dimension_numbers = #tpu.dot_dimension_numbers<[1], [0], [0], [1], [0, 0, 1, 1], [], []>} : vector<8x8xf32>, vector<8x8xf32>, vector<8x8xf32> -> vector<8x8xf32>
    %c0_31 = arith.constant 0 : index
    %c0_32 = arith.constant 0 : index
    %56 = vector.load %arg7[%c0_31, %c0_32] : memref<32x32xf32, #tpu.memory_space<vmem>>, vector<8x32xf32>
    %cst_33 = arith.constant dense<0.000000e+00> : vector<8x32xf32>
    %57 = tpu.matmul %55, %56, %cst_33 {dimension_numbers = #tpu.dot_dimension_numbers<[1], [0], [0], [1], [0, 0, 1, 1], [], []>} : vector<8x8xf32>, vector<8x32xf32>, vector<8x32xf32> -> vector<8x32xf32>
    %58 = arith.addf %38, %57 : vector<8x32xf32>
    %59 = vector.extract_strided_slice %28 {offsets = [0, 8], sizes = [8, 8], strides = [1, 1]} : vector<8x32xf32> to vector<8x8xf32>
    %60 = vector.extract_strided_slice %35 {offsets = [0, 8], sizes = [8, 8], strides = [1, 1]} : vector<8x64xf32> to vector<8x8xf32>
    %61 = vector.extract_strided_slice %35 {offsets = [0, 40], sizes = [8, 8], strides = [1, 1]} : vector<8x64xf32> to vector<8x8xf32>
    %cst_34 = arith.constant dense<0.000000e+00> : vector<8x8xf32>
    %62 = tpu.matmul %59, %60, %cst_34 {dimension_numbers = #tpu.dot_dimension_numbers<[1], [1], [0], [0], [0, 0, 1, 0], [], []>} : vector<8x8xf32>, vector<8x8xf32>, vector<8x8xf32> -> vector<8x8xf32>
    %63 = vector.broadcast %37 : vector<1x8xf32> to vector<8x8xf32>
    %64 = arith.addf %62, %63 : vector<8x8xf32>
    %cst_35 = arith.constant dense<0xFF800000> : vector<8xf32>
    %65 = vector.multi_reduction <maximumf>, %64, %cst_35 [1] : vector<8x8xf32> to vector<8xf32>
    %66 = vector.shape_cast %65 : vector<8xf32> to vector<8x1xf32>
    %67 = vector.broadcast %66 : vector<8x1xf32> to vector<8x8xf32>
    %68 = arith.subf %64, %67 : vector<8x8xf32>
    %69 = math.exp %68 : vector<8x8xf32>
    %cst_36 = arith.constant dense<0.000000e+00> : vector<8xf32>
    %70 = vector.multi_reduction <add>, %69, %cst_36 [1] : vector<8x8xf32> to vector<8xf32>
    %71 = vector.shape_cast %70 : vector<8xf32> to vector<8x1xf32>
    %72 = tpu.reciprocal %71 {approx = true} : vector<8x1xf32> -> vector<8x1xf32>
    %73 = vector.broadcast %72 : vector<8x1xf32> to vector<8x8xf32>
    %74 = arith.mulf %69, %73 : vector<8x8xf32>
    %cst_37 = arith.constant dense<0.000000e+00> : vector<8x8xf32>
    %75 = tpu.matmul %74, %61, %cst_37 {dimension_numbers = #tpu.dot_dimension_numbers<[1], [0], [0], [1], [0, 0, 1, 1], [], []>} : vector<8x8xf32>, vector<8x8xf32>, vector<8x8xf32> -> vector<8x8xf32>
    %c8 = arith.constant 8 : index
    %c0_38 = arith.constant 0 : index
    %76 = vector.load %arg7[%c8, %c0_38] : memref<32x32xf32, #tpu.memory_space<vmem>>, vector<8x32xf32>
    %cst_39 = arith.constant dense<0.000000e+00> : vector<8x32xf32>
    %77 = tpu.matmul %75, %76, %cst_39 {dimension_numbers = #tpu.dot_dimension_numbers<[1], [0], [0], [1], [0, 0, 1, 1], [], []>} : vector<8x8xf32>, vector<8x32xf32>, vector<8x32xf32> -> vector<8x32xf32>
    %78 = arith.addf %58, %77 : vector<8x32xf32>
    %79 = vector.extract_strided_slice %28 {offsets = [0, 16], sizes = [8, 8], strides = [1, 1]} : vector<8x32xf32> to vector<8x8xf32>
    %80 = vector.extract_strided_slice %35 {offsets = [0, 16], sizes = [8, 8], strides = [1, 1]} : vector<8x64xf32> to vector<8x8xf32>
    %81 = vector.extract_strided_slice %35 {offsets = [0, 48], sizes = [8, 8], strides = [1, 1]} : vector<8x64xf32> to vector<8x8xf32>
    %cst_40 = arith.constant dense<0.000000e+00> : vector<8x8xf32>
    %82 = tpu.matmul %79, %80, %cst_40 {dimension_numbers = #tpu.dot_dimension_numbers<[1], [1], [0], [0], [0, 0, 1, 0], [], []>} : vector<8x8xf32>, vector<8x8xf32>, vector<8x8xf32> -> vector<8x8xf32>
    %83 = vector.broadcast %37 : vector<1x8xf32> to vector<8x8xf32>
    %84 = arith.addf %82, %83 : vector<8x8xf32>
    %cst_41 = arith.constant dense<0xFF800000> : vector<8xf32>
    %85 = vector.multi_reduction <maximumf>, %84, %cst_41 [1] : vector<8x8xf32> to vector<8xf32>
    %86 = vector.shape_cast %85 : vector<8xf32> to vector<8x1xf32>
    %87 = vector.broadcast %86 : vector<8x1xf32> to vector<8x8xf32>
    %88 = arith.subf %84, %87 : vector<8x8xf32>
    %89 = math.exp %88 : vector<8x8xf32>
    %cst_42 = arith.constant dense<0.000000e+00> : vector<8xf32>
    %90 = vector.multi_reduction <add>, %89, %cst_42 [1] : vector<8x8xf32> to vector<8xf32>
    %91 = vector.shape_cast %90 : vector<8xf32> to vector<8x1xf32>
    %92 = tpu.reciprocal %91 {approx = true} : vector<8x1xf32> -> vector<8x1xf32>
    %93 = vector.broadcast %92 : vector<8x1xf32> to vector<8x8xf32>
    %94 = arith.mulf %89, %93 : vector<8x8xf32>
    %cst_43 = arith.constant dense<0.000000e+00> : vector<8x8xf32>
    %95 = tpu.matmul %94, %81, %cst_43 {dimension_numbers = #tpu.dot_dimension_numbers<[1], [0], [0], [1], [0, 0, 1, 1], [], []>} : vector<8x8xf32>, vector<8x8xf32>, vector<8x8xf32> -> vector<8x8xf32>
    %c16 = arith.constant 16 : index
    %c0_44 = arith.constant 0 : index
    %96 = vector.load %arg7[%c16, %c0_44] : memref<32x32xf32, #tpu.memory_space<vmem>>, vector<8x32xf32>
    %cst_45 = arith.constant dense<0.000000e+00> : vector<8x32xf32>
    %97 = tpu.matmul %95, %96, %cst_45 {dimension_numbers = #tpu.dot_dimension_numbers<[1], [0], [0], [1], [0, 0, 1, 1], [], []>} : vector<8x8xf32>, vector<8x32xf32>, vector<8x32xf32> -> vector<8x32xf32>
    %98 = arith.addf %78, %97 : vector<8x32xf32>
    %99 = vector.extract_strided_slice %28 {offsets = [0, 24], sizes = [8, 8], strides = [1, 1]} : vector<8x32xf32> to vector<8x8xf32>
    %100 = vector.extract_strided_slice %35 {offsets = [0, 24], sizes = [8, 8], strides = [1, 1]} : vector<8x64xf32> to vector<8x8xf32>
    %101 = vector.extract_strided_slice %35 {offsets = [0, 56], sizes = [8, 8], strides = [1, 1]} : vector<8x64xf32> to vector<8x8xf32>
    %cst_46 = arith.constant dense<0.000000e+00> : vector<8x8xf32>
    %102 = tpu.matmul %99, %100, %cst_46 {dimension_numbers = #tpu.dot_dimension_numbers<[1], [1], [0], [0], [0, 0, 1, 0], [], []>} : vector<8x8xf32>, vector<8x8xf32>, vector<8x8xf32> -> vector<8x8xf32>
    %103 = vector.broadcast %37 : vector<1x8xf32> to vector<8x8xf32>
    %104 = arith.addf %102, %103 : vector<8x8xf32>
    %cst_47 = arith.constant dense<0xFF800000> : vector<8xf32>
    %105 = vector.multi_reduction <maximumf>, %104, %cst_47 [1] : vector<8x8xf32> to vector<8xf32>
    %106 = vector.shape_cast %105 : vector<8xf32> to vector<8x1xf32>
    %107 = vector.broadcast %106 : vector<8x1xf32> to vector<8x8xf32>
    %108 = arith.subf %104, %107 : vector<8x8xf32>
    %109 = math.exp %108 : vector<8x8xf32>
    %cst_48 = arith.constant dense<0.000000e+00> : vector<8xf32>
    %110 = vector.multi_reduction <add>, %109, %cst_48 [1] : vector<8x8xf32> to vector<8xf32>
    %111 = vector.shape_cast %110 : vector<8xf32> to vector<8x1xf32>
    %112 = tpu.reciprocal %111 {approx = true} : vector<8x1xf32> -> vector<8x1xf32>
    %113 = vector.broadcast %112 : vector<8x1xf32> to vector<8x8xf32>
    %114 = arith.mulf %109, %113 : vector<8x8xf32>
    %cst_49 = arith.constant dense<0.000000e+00> : vector<8x8xf32>
    %115 = tpu.matmul %114, %101, %cst_49 {dimension_numbers = #tpu.dot_dimension_numbers<[1], [0], [0], [1], [0, 0, 1, 1], [], []>} : vector<8x8xf32>, vector<8x8xf32>, vector<8x8xf32> -> vector<8x8xf32>
    %c24 = arith.constant 24 : index
    %c0_50 = arith.constant 0 : index
    %116 = vector.load %arg7[%c24, %c0_50] : memref<32x32xf32, #tpu.memory_space<vmem>>, vector<8x32xf32>
    %cst_51 = arith.constant dense<0.000000e+00> : vector<8x32xf32>
    %117 = tpu.matmul %115, %116, %cst_51 {dimension_numbers = #tpu.dot_dimension_numbers<[1], [0], [0], [1], [0, 0, 1, 1], [], []>} : vector<8x8xf32>, vector<8x32xf32>, vector<8x32xf32> -> vector<8x32xf32>
    %118 = arith.addf %98, %117 : vector<8x32xf32>
    %119 = arith.addf %1, %118 : vector<8x32xf32>
    %c0_52 = arith.constant 0 : index
    %c0_53 = arith.constant 0 : index
    %120 = vector.load %arg8[%c0_52, %c0_53] : memref<1x32xf32, #tpu.memory_space<vmem>>, vector<1x32xf32>
    %121 = vector.broadcast %120 : vector<1x32xf32> to vector<8x32xf32>
    %122 = arith.addf %119, %121 : vector<8x32xf32>
    %c0_54 = arith.constant 0 : index
    %c0_55 = arith.constant 0 : index
    %c0_56 = arith.constant 0 : index
    %123 = vector.load %arg12[%c0_54, %c0_55, %c0_56] : memref<1x8x32xf32, #tpu.memory_space<vmem>>, vector<1x8x32xf32>
    %124 = vector.shape_cast %123 : vector<1x8x32xf32> to vector<8x32xf32>
    %125 = vector.shape_cast %122 : vector<8x32xf32> to vector<1x8x32xf32>
    tpu.vector_store %arg12[%c0_54, %c0_55, %c0_56], %125 {strides = array<i32>} : memref<1x8x32xf32, #tpu.memory_space<vmem>>, vector<1x8x32xf32>,
    return
  }
  func.func @transform_0(%arg0: i32) -> (i32, i32, i32) {
    %c0_i32 = arith.constant 0 : i32
    %c0_i32_0 = arith.constant 0 : i32
    %c0_i32_1 = arith.constant 0 : i32
    return %arg0, %c0_i32, %c0_i32_0 : i32, i32, i32
  }
  func.func @transform_1(%arg0: i32) -> (i32, i32, i32) {
    %c0_i32 = arith.constant 0 : i32
    %c0_i32_0 = arith.constant 0 : i32
    %c0_i32_1 = arith.constant 0 : i32
    return %arg0, %c0_i32, %c0_i32_0 : i32, i32, i32
  }
  func.func @transform_2(%arg0: i32) -> (i32, i32) {
    %c0_i32 = arith.constant 0 : i32
    %c0_i32_0 = arith.constant 0 : i32
    %c0_i32_1 = arith.constant 0 : i32
    return %c0_i32, %c0_i32_0 : i32, i32
  }
  func.func @transform_3(%arg0: i32) -> (i32, i32) {
    %c0_i32 = arith.constant 0 : i32
    %c0_i32_0 = arith.constant 0 : i32
    %c0_i32_1 = arith.constant 0 : i32
    return %c0_i32, %c0_i32_0 : i32, i32
  }
  func.func @transform_4(%arg0: i32) -> (i32, i32) {
    %c0_i32 = arith.constant 0 : i32
    %c0_i32_0 = arith.constant 0 : i32
    %c0_i32_1 = arith.constant 0 : i32
    return %c0_i32, %c0_i32_0 : i32, i32
  }
  func.func @transform_5(%arg0: i32) -> (i32, i32) {
    %c0_i32 = arith.constant 0 : i32
    %c0_i32_0 = arith.constant 0 : i32
    %c0_i32_1 = arith.constant 0 : i32
    return %c0_i32, %c0_i32_0 : i32, i32
  }
  func.func @transform_6(%arg0: i32) -> (i32, i32) {
    %c0_i32 = arith.constant 0 : i32
    %c0_i32_0 = arith.constant 0 : i32
    %c0_i32_1 = arith.constant 0 : i32
    return %c0_i32, %c0_i32_0 : i32, i32
  }
  func.func @transform_7(%arg0: i32) -> (i32, i32) {
    %c0_i32 = arith.constant 0 : i32
    %c0_i32_0 = arith.constant 0 : i32
    %c0_i32_1 = arith.constant 0 : i32
    return %c0_i32, %c0_i32_0 : i32, i32
  }
  func.func @transform_8(%arg0: i32) -> (i32, i32) {
    %c0_i32 = arith.constant 0 : i32
    %c0_i32_0 = arith.constant 0 : i32
    %c0_i32_1 = arith.constant 0 : i32
    return %c0_i32, %c0_i32_0 : i32, i32
  }
  func.func @transform_9(%arg0: i32) -> (i32, i32) {
    %c0_i32 = arith.constant 0 : i32
    %c0_i32_0 = arith.constant 0 : i32
    %c0_i32_1 = arith.constant 0 : i32
    return %c0_i32, %c0_i32_0 : i32, i32
  }
  func.func @transform_10(%arg0: i32) -> (i32, i32, i32) {
    %c0_i32 = arith.constant 0 : i32
    %c0_i32_0 = arith.constant 0 : i32
    %c0_i32_1 = arith.constant 0 : i32
    return %arg0, %c0_i32, %c0_i32_0 : i32, i32, i32
  }
  func.func @transform_11(%arg0: i32) -> (i32, i32, i32) {
    %c0_i32 = arith.constant 0 : i32
    %c0_i32_0 = arith.constant 0 : i32
    %c0_i32_1 = arith.constant 0 : i32
    return %arg0, %c0_i32, %c0_i32_0 : i32, i32, i32
  }
}

module attributes {stable_mosaic.version = 11 : i64} {
  func.func @_layernorm_kernel(%arg0: i32, %arg1: memref<16x32xf32, #tpu.memory_space<vmem>>, %arg2: memref<1x32xf32, #tpu.memory_space<vmem>>, %arg3: memref<1x32xf32, #tpu.memory_space<vmem>>, %arg4: memref<16x32xf32, #tpu.memory_space<vmem>>) attributes {dimension_semantics = [#tpu.dimension_semantics<arbitrary>], iteration_bounds = array<i64: 1>, scalar_prefetch = 0 : i64, scratch_operands = 0 : i64, tpu.core_type = #tpu.core_type<tc>, window_params = [{pipeline_mode = #tpu.pipeline_mode<synchronous>, transform_indices = @transform_0, window_bounds = array<i64: 16, 32>}, {pipeline_mode = #tpu.pipeline_mode<synchronous>, transform_indices = @transform_1, window_bounds = array<i64: 1, 32>}, {pipeline_mode = #tpu.pipeline_mode<synchronous>, transform_indices = @transform_2, window_bounds = array<i64: 1, 32>}, {pipeline_mode = #tpu.pipeline_mode<synchronous>, transform_indices = @transform_3, window_bounds = array<i64: 16, 32>}]} {
    %c0 = arith.constant 0 : index
    %c0_0 = arith.constant 0 : index
    %0 = vector.load %arg1[%c0, %c0_0] : memref<16x32xf32, #tpu.memory_space<vmem>>, vector<16x32xf32>
    %c0_1 = arith.constant 0 : index
    %c0_2 = arith.constant 0 : index
    %1 = vector.load %arg2[%c0_1, %c0_2] : memref<1x32xf32, #tpu.memory_space<vmem>>, vector<1x32xf32>
    %c0_3 = arith.constant 0 : index
    %c0_4 = arith.constant 0 : index
    %2 = vector.load %arg3[%c0_3, %c0_4] : memref<1x32xf32, #tpu.memory_space<vmem>>, vector<1x32xf32>
    %cst = arith.constant dense<0.000000e+00> : vector<16xf32>
    %3 = vector.multi_reduction <add>, %0, %cst [1] : vector<16x32xf32> to vector<16xf32>
    %4 = vector.shape_cast %3 : vector<16xf32> to vector<16x1xf32>
    %cst_5 = arith.constant 3.200000e+01 : f32
    %5 = vector.broadcast %cst_5 : f32 to vector<16x1xf32>
    %6 = arith.divf %4, %5 : vector<16x1xf32>
    %7 = vector.broadcast %6 : vector<16x1xf32> to vector<16x32xf32>
    %8 = arith.subf %0, %7 : vector<16x32xf32>
    %9 = arith.mulf %8, %8 : vector<16x32xf32>
    %cst_6 = arith.constant dense<0.000000e+00> : vector<16xf32>
    %10 = vector.multi_reduction <add>, %9, %cst_6 [1] : vector<16x32xf32> to vector<16xf32>
    %11 = vector.shape_cast %10 : vector<16xf32> to vector<16x1xf32>
    %cst_7 = arith.constant 3.200000e+01 : f32
    %12 = vector.broadcast %cst_7 : f32 to vector<16x1xf32>
    %13 = arith.divf %11, %12 : vector<16x1xf32>
    %cst_8 = arith.constant 9.99999974E-6 : f32
    %14 = vector.broadcast %cst_8 : f32 to vector<16x1xf32>
    %15 = arith.addf %13, %14 : vector<16x1xf32>
    %16 = math.rsqrt %15 : vector<16x1xf32>
    %17 = vector.broadcast %16 : vector<16x1xf32> to vector<16x32xf32>
    %18 = arith.mulf %8, %17 : vector<16x32xf32>
    %19 = vector.broadcast %1 : vector<1x32xf32> to vector<16x32xf32>
    %20 = arith.mulf %18, %19 : vector<16x32xf32>
    %21 = vector.broadcast %2 : vector<1x32xf32> to vector<16x32xf32>
    %22 = arith.addf %20, %21 : vector<16x32xf32>
    %c0_9 = arith.constant 0 : index
    %c0_10 = arith.constant 0 : index
    %23 = vector.load %arg4[%c0_9, %c0_10] : memref<16x32xf32, #tpu.memory_space<vmem>>, vector<16x32xf32>
    tpu.vector_store %arg4[%c0_9, %c0_10], %22 {strides = array<i32>} : memref<16x32xf32, #tpu.memory_space<vmem>>, vector<16x32xf32>,
    return
  }
  func.func @transform_0(%arg0: i32) -> (i32, i32) {
    %c0_i32 = arith.constant 0 : i32
    %c0_i32_0 = arith.constant 0 : i32
    %c0_i32_1 = arith.constant 0 : i32
    return %c0_i32, %c0_i32_0 : i32, i32
  }
  func.func @transform_1(%arg0: i32) -> (i32, i32) {
    %c0_i32 = arith.constant 0 : i32
    %c0_i32_0 = arith.constant 0 : i32
    %c0_i32_1 = arith.constant 0 : i32
    return %c0_i32, %c0_i32_0 : i32, i32
  }
  func.func @transform_2(%arg0: i32) -> (i32, i32) {
    %c0_i32 = arith.constant 0 : i32
    %c0_i32_0 = arith.constant 0 : i32
    %c0_i32_1 = arith.constant 0 : i32
    return %c0_i32, %c0_i32_0 : i32, i32
  }
  func.func @transform_3(%arg0: i32) -> (i32, i32) {
    %c0_i32 = arith.constant 0 : i32
    %c0_i32_0 = arith.constant 0 : i32
    %c0_i32_1 = arith.constant 0 : i32
    return %c0_i32, %c0_i32_0 : i32, i32
  }
}

</mosaic_0001>

<bundles_post_ra>
// kernel: encoder_decoder_forward.13
= control target key start
LH: loop header
LB: loop body
LE: loop exit
PB: predicated region body
PF: predicated region fallthrough
CT: control target
= control target key end

     0   :  { %vm18_vm0 = vcmask 261120   ;;  %s118_s0 = inlined_call_operand.vmem [shape: f32[16,32], index: 0, kind: input, shape index: {}]   ;;  %s119_s1 = inlined_call_operand.vmem [shape: f32[1,32], index: 1, kind: input, shape index: {}]   ;;  %s120_s2 = inlined_call_operand.vmem [shape: f32[1,32], index: 2, kind: input, shape index: {}]   ;;  %s121_s3 = inlined_call_operand.vmem [shape: f32[16,32], index: 3, kind: output, shape index: {}]  }
   0x1   :  { %v14_v0 = vld [vmem:[%s118_s0] sm:$0xff]  ;;  %v15_v1 = vld [vmem:[%s118_s0 + $0x8] sm:$0xff] }
   0x2   :  { %v19_v2 = vsel %vm18_vm0, %v14_v0, 0.0  ;;  %v22_v3 = vsel %vm18_vm0, %v15_v1, 0.0  ;;  %v68_v21 = vld [vmem:[%s119_s1] ss:$0 sm:$0xff] }
   0x3   :  { %20 = vadd.xlane.f32.xlu0 %v19_v2  ;;  %v69_v23 = vld [vmem:[%s120_s2] ss:$0 sm:$0xff] }
   0x7   :  { %23 = vadd.xlane.f32.xlu0 %v22_v3 }
  0x90   :  { %v21_v4 = vpop.xlane.xlu0 %20 }
  0x91   :  { %v26_v5 = vmul.f32 0.03125, %v21_v4 }
  0x93   :  { %v28_v6 = vsub.f32 %v14_v0, %v26_v5 }
  0x94   :  { %v24_v7 = vpop.xlane.xlu0 %23 }
  0x95   :  { %v27_v8 = vmul.f32 0.03125, %v24_v7  ;;  %v30_v9 = vmul.f32 %v28_v6, %v28_v6 }
  0x97   :  { %v29_v10 = vsub.f32 %v15_v1, %v27_v8  ;;  %v32_v11 = vsel %vm18_vm0, %v30_v9, 0.0 }
  0x98   :  { %33 = vadd.xlane.f32.xlu1 %v32_v11 }
  0x99   :  { %v31_v12 = vmul.f32 %v29_v10, %v29_v10 }
  0x9b   :  { %v35_v13 = vsel %vm18_vm0, %v31_v12, 0.0 }
  0x9c   :  { %36 = vadd.xlane.f32.xlu1 %v35_v13 }
 0x125   :  { %v34_v14 = vpop.xlane.xlu1 %33 }
 0x126   :  { %v38_v15 = vmul.f32 0.03125, %v34_v14 }
 0x128   :  { %v40_v16 = vadd.f32 1e-05, %v38_v15 }
 0x129   :  { %v37_v17 = vpop.xlane.xlu1 %36 }
 0x12a   :  { %70 = vrsqrt.f32 %v40_v16  ;;  %v39_v18 = vmul.f32 0.03125, %v37_v17 }
 0x12c   :  { %v41_v19 = vadd.f32 1e-05, %v39_v18 }
 0x12e   :  { %72 = vrsqrt.f32 %v41_v19 }
 0x134   :  { %v71_v20 = vpop.eup %70 }
 0x135   :  { %v44_v22 = vmul.f32 %v71_v20, %v28_v6 }
 0x137   :  { %v52_v24 = vmul.f32 %v68_v21, %v44_v22 }
 0x138   :  { %v73_v25 = vpop.eup %72 }
 0x139   :  { %v60_v26 = vadd.f32 %v69_v23, %v52_v24  ;;  %v45_v27 = vmul.f32 %v73_v25, %v29_v10 }
 0x13b   :  { %62 = vst.msk [vmem:[%s121_s3] sm:$0xff] %vm18_vm0, %v60_v26  ;;  %v53_v28 = vmul.f32 %v68_v21, %v45_v27 }
 0x13d   :  { %v61_v29 = vadd.f32 %v69_v23, %v53_v28 }
 0x13f   :  { %63 = vst.msk [vmem:[%s121_s3 + $0x8] sm:$0xff] %vm18_vm0, %v61_v29 }

// kernel: encoder_decoder_forward.10
= control target key start
LH: loop header
LB: loop body
LE: loop exit
PB: predicated region body
PF: predicated region fallthrough
CT: control target
= control target key end

     0   :  { %vm30_vm0 = vcmask 261120   ;;  %vm176_vm1 = vcmask 523264   ;;  %s475_s0 = inlined_call_operand.vmem [shape: f32[16,32], index: 0, kind: input, shape index: {}]   ;;  %s476_s1 = inlined_call_operand.vmem [shape: f32[32,64], index: 1, kind: input, shape index: {}]   ;;  %s477_s3 = inlined_call_operand.vmem [shape: f32[64,32], index: 3, kind: input, shape index: {}]   ;;  %s478_s5 = inlined_call_operand.vmem [shape: f32[1,32], index: 5, kind: input, shape index: {}]   ;;  %s479_s6 = inlined_call_operand.vmem [shape: f32[1,32], index: 6, kind: input, shape index: {}]   ;;  %s480_s2 = inlined_call_operand.vmem [shape: f32[1,64], index: 2, kind: input, shape index: {}]   ;;  %s481_s4 = inlined_call_operand.vmem [shape: f32[1,32], index: 4, kind: input, shape index: {}]   ;;  %s482_s7 = inlined_call_operand.vmem [shape: f32[16,32], index: 7, kind: output, shape index: {}]  }
   0x1   :  { %v400_v0 = vld [vmem:[%s475_s0] sm:$0xff]  ;;  %v405_v1 = vld [vmem:[%s475_s0 + $0x8] sm:$0xff]  ;;  %v76_v16 = vld [vmem:[%s476_s1 + $0x10] sm:$0xff] }
   0x2   :  { %v31_v2 = vsel %vm30_vm0, %v400_v0, 0.0  ;;  %v34_v3 = vsel %vm30_vm0, %v405_v1, 0.0  ;;  %v74_v14 = vld [vmem:[%s476_s1] sm:$0xff]  ;;  %v75_v15 = vld [vmem:[%s476_s1 + $0x8] sm:$0xff]  ;;  %v77_v18 = vld [vmem:[%s476_s1 + $0x18] sm:$0xff] }
   0x3   :  { %32 = vadd.xlane.f32.xlu0 %v31_v2  ;;  %v329_v17 = vpack.c.bf16 %v75_v15, %v74_v14  ;;  %v333_v19 = vpack.c.bf16 %v77_v18, %v76_v16  ;;  %v168_v20 = vld [vmem:[%s477_s3] sm:$0xff]  ;;  %v169_v21 = vld [vmem:[%s477_s3 + $0x8] sm:$0xff]  ;;  %v170_v22 = vld [vmem:[%s477_s3 + $0x10] sm:$0xff] }
   0x4   :  { %v337_v23 = vpack.c.bf16 %v169_v21, %v168_v20  ;;  %v171_v24 = vld [vmem:[%s477_s3 + $0x18] sm:$0xff]  ;;  %v172_v26 = vld [vmem:[%s477_s3 + $0x20] sm:$0xff]  ;;  %v173_v27 = vld [vmem:[%s477_s3 + $0x28] sm:$0xff] }
   0x5   :  { %330 = vmatprep.subr.bf16.mxu0 %v329_v17  ;;  %v341_v25 = vpack.c.bf16 %v171_v24, %v170_v22  ;;  %v345_v28 = vpack.c.bf16 %v173_v27, %v172_v26  ;;  %v275_v36 = vld [vmem:[%s478_s5] ss:$0 sm:$0xff]  ;;  %v174_v45 = vld [vmem:[%s477_s3 + $0x30] sm:$0xff]  ;;  %v175_v46 = vld [vmem:[%s477_s3 + $0x38] sm:$0xff] }
   0x6   :  { %332 = vmatpush3.bf16.msra.mxu0 %v329_v17  ;;  %338 = vmatprep.subr.bf16.mxu1 %v337_v23  ;;  %v276_v38 = vld [vmem:[%s479_s6] ss:$0 sm:$0xff]  ;;  %v349_v47 = vpack.c.bf16 %v175_v46, %v174_v45 }
   0x7   :  { %35 = vadd.xlane.f32.xlu0 %v34_v3  ;;  %334 = vmatprep.subr.bf16.mxu0 %v333_v19  ;;  %v277_v48 = vld [vmem:[%s480_s2] ss:$0 sm:$0xff] }
   0x8   :  { %340 = vmatpush3.bf16.msra.mxu1 %v337_v23  ;;  %v282_v56 = vld [vmem:[%s481_s4] ss:$0 sm:$0xff] }
   0x9   :  { %342 = vmatprep.subr.bf16.mxu1 %v341_v25 }
   0xa   :  { %336 = vmatpush3.bf16.msra.mxu0 %v333_v19 }
   0xc   :  { %344 = vmatpush3.bf16.msra.mxu1 %v341_v25 }
   0xd   :  { %346 = vmatprep.subr.bf16.mxu1 %v345_v28 }
  0x10   :  { %348 = vmatpush3.bf16.msra.mxu1 %v345_v28 }
  0x11   :  { %350 = vmatprep.subr.bf16.mxu1 %v349_v47 }
  0x14   :  { %352 = vmatpush3.bf16.msra.mxu1 %v349_v47 }
  0x90   :  { %v33_v4 = vpop.xlane.xlu0 %32 }
  0x91   :  { %v38_v5 = vmul.f32 0.03125, %v33_v4 }
  0x93   :  { %v40_v6 = vsub.f32 %v400_v0, %v38_v5 }
  0x94   :  { %v36_v7 = vpop.xlane.xlu0 %35 }
  0x95   :  { %v39_v8 = vmul.f32 0.03125, %v36_v7  ;;  %v42_v9 = vmul.f32 %v40_v6, %v40_v6 }
  0x97   :  { %v41_v10 = vsub.f32 %v405_v1, %v39_v8  ;;  %v44_v11 = vsel %vm30_vm0, %v42_v9, 0.0 }
  0x98   :  { %45 = vadd.xlane.f32.xlu1 %v44_v11 }
  0x99   :  { %v43_v12 = vmul.f32 %v41_v10, %v41_v10 }
  0x9b   :  { %v47_v13 = vsel %vm30_vm0, %v43_v12, 0.0 }
  0x9c   :  { %48 = vadd.xlane.f32.xlu1 %v47_v13 }
 0x125   :  { %v46_v29 = vpop.xlane.xlu1 %45 }
 0x126   :  { %v50_v30 = vmul.f32 0.03125, %v46_v29 }
 0x128   :  { %v52_v31 = vadd.f32 1e-05, %v50_v30 }
 0x129   :  { %v49_v32 = vpop.xlane.xlu1 %48 }
 0x12a   :  { %353 = vrsqrt.f32 %v52_v31  ;;  %v51_v33 = vmul.f32 0.03125, %v49_v32 }
 0x12c   :  { %v53_v34 = vadd.f32 1e-05, %v51_v33 }
 0x12e   :  { %355 = vrsqrt.f32 %v53_v34 }
 0x134   :  { %v354_v35 = vpop.eup %353 }
 0x135   :  { %v56_v37 = vmul.f32 %v354_v35, %v40_v6 }
 0x137   :  { %v64_v39 = vmul.f32 %v275_v36, %v56_v37 }
 0x138   :  { %v356_v40 = vpop.eup %355 }
 0x139   :  { %v57_v41 = vmul.f32 %v356_v40, %v41_v10  ;;  %v72_v42 = vadd.f32 %v276_v38, %v64_v39 }
 0x13b   :  { %v65_v43 = vmul.f32 %v275_v36, %v57_v41  ;;  %307 = vmatprep.mubr.msk.f32.mxu0 %vm30_vm0, %v72_v42 }
 0x13d   :  { %v73_v44 = vadd.f32 %v276_v38, %v65_v43 }
 0x13f   :  { %308 = vmatmul.mubr.msk.f32.vlgmr.msra.gmra.mrb[0].mxu0 %vm30_vm0, %v73_v44 }
 0x212   :  { %v309_v49 = vpop.f32.mrb[0].mxu0 }
 0x213   :  { %v163_v50 = vadd.f32 %v309_v49, %v277_v48  ;;  %v157_v51 = vpop.f32.mrb[1].mxu0 }
 0x214   :  { %v158_v52 = vadd.f32 %v277_v48, %v157_v51 }
 0x215   :  { %v167_v54 = vmax.f32 %v163_v50, 0.0 }
 0x216   :  { %v166_v53 = vmax.f32 %v158_v52, 0.0 }
 0x218   :  { %326 = vmatprep.mubr.msk.f32.mxu1 %vm176_vm1, %v166_v53 }
 0x219   :  { %327 = vmatmul.mubr.msk.f32.vlgmr.msra.gmra.mrb[0].mxu1 %vm176_vm1, %v167_v54 }
 0x2ec   :  { %v328_v55 = vpop.f32.mrb[0].mxu1 }
 0x2ed   :  { %v259_v57 = vadd.f32 %v328_v55, %v405_v1  ;;  %v249_v58 = vpop.f32.mrb[1].mxu1 }
 0x2ee   :  { %v258_v59 = vadd.f32 %v249_v58, %v400_v0 }
 0x2ef   :  { %v268_v60 = vadd.f32 %v282_v56, %v259_v57 }
 0x2f0   :  { %v267_v61 = vadd.f32 %v282_v56, %v258_v59 }
 0x2f1   :  { %270 = vst.msk [vmem:[%s482_s7 + $0x8] sm:$0xff] %vm30_vm0, %v268_v60 }
 0x2f2   :  { %269 = vst.msk [vmem:[%s482_s7] sm:$0xff] %vm30_vm0, %v267_v61 }

// kernel: encoder_decoder_forward.9
= control target key start
LH: loop header
LB: loop body
LE: loop exit
PB: predicated region body
PF: predicated region fallthrough
CT: control target
= control target key end

     0   :  { %s1712_s27 = smov 0   ;;  %s1867_s0 = inlined_call_operand.vmem [shape: f32[2,8,32], index: 0, kind: input, shape index: {}]   ;;  %s1868_s1 = inlined_call_operand.vmem [shape: f32[32,96], index: 1, kind: input, shape index: {}]   ;;  %s1869_s2 = inlined_call_operand.vmem [shape: f32[1,96], index: 2, kind: input, shape index: {}]   ;;  %s1870_s3 = inlined_call_operand.vmem [shape: f32[32,32], index: 3, kind: input, shape index: {}]   ;;  %s1871_s4 = inlined_call_operand.vmem [shape: f32[1,32], index: 4, kind: input, shape index: {}]   ;;  %s1872_s5 = inlined_call_operand.vmem [shape: f32[1,32], index: 5, kind: input, shape index: {}]   ;;  %s1873_s6 = inlined_call_operand.vmem [shape: f32[1,32], index: 6, kind: input, shape index: {}]   ;;  %s1874_s7 = inlined_call_operand.vmem [shape: f32[2,1,8], index: 7, kind: input, shape index: {}]   ;;  %s1875_s8 = inlined_call_operand.vmem [shape: f32[2,8,32], index: 8, kind: output, shape index: {}]  }
   0x1 LB: > { %s1468_s28 = sadd.s32 4294967295, %s1651_s27   ;;  %p1472_p0 = scmp.ge.s32.totalorder %s1651_s27, 1  ;;  %s1651_s27 = sphi %s1712_s27, %s18_s27  }
   0x2   : > { %p269_p1 = scmp.lt.s32.totalorder %s1651_s27, 3 }
   0x4   : > { %p270_p2 = pnand %p1472_p0, %p269_p1 }
   0x5   : > { %p304_p3 = scmp.lt.s32.totalorder (!%p270_p2), %s1468_s28, 1  ;;  %vm318_vm0 = vcmask (!%p270_p2), 261120   ;;  %v347_v7 = vld [vmem:[%s1868_s1] sm:$0xff] (!%p270_p2)  ;;  %v348_v8 = vld [vmem:[%s1868_s1 + $0x8] sm:$0xff] (!%p270_p2)  ;;  %v349_v9 = vld [vmem:[%s1868_s1 + $0x10] sm:$0xff] (!%p270_p2)  ;;  %v1653_v10 = vmov (!%p270_p2), 0.0|0.0  }
   0x6   : > { %273 = sbr.rel (%p270_p2) target bundleno = 2901 (0xb55), region = 52  ;;  %1599 = vmatprep.subr.bf16.mxu0 (!%p270_p2), %v1653_v10  ;;  %v1600_v11 = vpack.c.bf16 (!%p270_p2), %v348_v8, %v347_v7  ;;  %v350_v12 = vld [vmem:[%s1868_s1 + $0x18] sm:$0xff] (!%p270_p2)  ;;  %vm1654_vm1 = vmmov (!%p270_p2), 0   ;;  %v1655_v13 = vmov (!%p270_p2), 0.0   ;;  %v1475_v19 = vld [vmem:[%s1872_s5] ss:$0 sm:$0xff] (!%p270_p2) }
   0x7   : > { %1536 = vmatprep.mubr.msk.f32.mxu0 (!%p270_p2), %vm1654_vm1, %v1655_v13  ;;  %1539 = vmatprep.subr.mxu1 (!%p270_p2), %v1655_v13  ;;  %v1603_v14 = vpack.c.bf16 (!%p270_p2), %v350_v12, %v349_v9  ;;  %v1476_v21 = vld [vmem:[%s1873_s6] ss:$0 sm:$0xff] (!%p270_p2)  ;;  %s1656_s25 = smov (!%p270_p2), 120   ;;  %s1657_s26 = smov (!%p270_p2), 96   ;;  %vm441_vm2 = vcmask (!%p270_p2), 64512   ;;  %v769_v50 = vld [vmem:[%s1870_s3 + $0x8] sm:$0xff] (!%p270_p2) }
   0x8   : > { %1541 = vmatprep.mubr.msk.f32.mxu1 (!%p270_p2), %vm1654_vm1, %v1655_v13  ;;  %1601 = vmatpush3.bf16.msra.mxu0 (!%p270_p2), %v1600_v11  ;;  %v1477_v24 = vld [vmem:[%s1869_s2] ss:$0 sm:$0xff] (!%p270_p2)  ;;  %s1658_s30 = smov (!%p270_p2), 88   ;;  %s1659_s12 = smov (!%p270_p2), 56  }
   0x9   : > { %1602 = vmatprep.subr.bf16.mxu0 (!%p270_p2), %v1653_v10  ;;  %s1660_s13 = smov (!%p270_p2), 64   ;;  %s1661_s14 = smov (!%p270_p2), 80   ;;  %v603_v59 = vld [vmem:[%s1870_s3] sm:$0xff] (!%p270_p2) }
   0xa   : > { %s1662_s15 = smov (!%p270_p2), 112   ;;  %s1663_s20 = smov (!%p270_p2), 48  }
   0xb   : > { %s1664_s21 = smov (!%p270_p2), 104   ;;  %s1665_s22 = smov (!%p270_p2), 72  }
   0xc   : > { %1604 = vmatpush3.bf16.msra.mxu0 (!%p270_p2), %v1603_v14 }
   0xd   : > { %s1877_s28 = smov (!%p304_p3, %s1468_s28), 1  ;;  %1549 = vmatprep.subr.mxu0 %v1655_v13 }
   0xe   : > { %s1473_s29 = sshll.u32 %s1877_s28, 3  ;;  %s310_s11 = scalar_lea.vmem %s1874_s7, %s1877_s28 }
   0xf   : > { %s307_s10 = scalar_lea.vmem %s1867_s0, %s1473_s29  ;;  %v1784_v31 = vld [vmem:[%s310_s11] ss:$0 sm:$0xff] }
  0x10   : > { %v1728_v0 = vld [vmem:[%s307_s10] sm:$0xff] }
  0x11   : > { %v319_v1 = vsel %vm318_vm0, %v1728_v0, 0.0 }
  0x12   : > { %320 = vadd.xlane.f32.xlu0 %v319_v1 }
  0x9f   : > { %v321_v2 = vpop.xlane.xlu0 %320 }
  0xa0   : > { %v323_v3 = vmul.f32 0.03125, %v321_v2 }
  0xa2   : > { %v324_v4 = vsub.f32 %v1728_v0, %v323_v3 }
  0xa4   : > { %v325_v5 = vmul.f32 %v324_v4, %v324_v4 }
  0xa6   : > { %v326_v6 = vsel %vm318_vm0, %v325_v5, 0.0 }
  0xa7   : > { %327 = vadd.xlane.f32.xlu0 %v326_v6 }
 0x134   : > { %v328_v15 = vpop.xlane.xlu0 %327 }
 0x135   : > { %v329_v16 = vmul.f32 0.03125, %v328_v15 }
 0x137   : > { %v330_v17 = vadd.f32 1e-05, %v329_v16 }
 0x139   : > { %1627 = vrsqrt.f32 %v330_v17 }
 0x143   : > { %v1628_v18 = vpop.eup %1627 }
 0x144   : > { %v332_v20 = vmul.f32 %v1628_v18, %v324_v4 }
 0x146   : > { %v339_v22 = vmul.f32 %v1475_v19, %v332_v20 }
 0x148   : > { %v346_v23 = vadd.f32 %v1476_v21, %v339_v22 }
 0x14a   : > { %1537 = vmatmul.mubr.msk.f32.vlgmr.msra.gmra.mrb[0].mxu0 %vm318_vm0, %v346_v23 }
 0x14b   : > { %1551 = vmatprep.mubr.msk.f32.mxu0 %vm1654_vm1, %v1655_v13 }
 0x21d   : > { %v427_v25 = vpop.f32.mrb[0].mxu0 }
 0x21e   : > { %v1764_v26 = vadd.f32 %v1477_v24, %v427_v25  ;;  %v1538_v27 = vpop.f32.mrb[1].mxu0  ;;  %v1081_v24 = vld [vmem:[%s1870_s3 + $0x10] sm:$0xff] }
 0x220   : > { %604 = vrot.lane.b32.xlu0 %v1764_v26, %s1656_s25  ;;  %439 = vrot.lane.b32.xlu1 %v1764_v26, %s1657_s26  ;;  %s1666_s25 = smov 40  }
 0x224   : > { %606 = vrot.lane.b32.xlu1 %v1764_v26, %s1658_s30 }
 0x292   : > { %v440_v28 = vpop.permute.xlu1 %439  ;;  %v605_v30 = vpop.permute.xlu0 %604 }
 0x293   : > { %1540 = vmatpush3.xpose.msk.msra.mxu1 %vm441_vm2, %v440_v28 }
 0x294   : > { %1544 = vmatprep.subr.mxu1 %v1655_v13 }
 0x296   : > { %1542 = vmatmul.mubr.msk.f32.vlgmr.msra.gmra.mrb[0].mxu1 %vm441_vm2, %v1764_v26  ;;  %v607_v29 = vpop.permute.xlu1 %606 }
 0x297   : > { %1550 = vmatpush3.xpose.msk.msra.mxu0 %vm441_vm2, %v607_v29  ;;  %1546 = vmatprep.mubr.msk.f32.mxu1 %vm1654_vm1, %v1655_v13 }
 0x298   : > { %1559 = vmatprep.subr.mxu0 %v1655_v13 }
 0x29a   : > { %1552 = vmatmul.mubr.msk.f32.vlgmr.msra.gmra.mrb[2].mxu0 %vm441_vm2, %v605_v30 }
 0x29b   : > { %1561 = vmatprep.mubr.msk.f32.mxu0 %vm1654_vm1, %v1655_v13  ;;  %1560 = vmatpush3.msra.mxu0 %v769_v50 }
 0x29c   : > { %1569 = vmatprep.subr.mxu0 %v1655_v13 }
 0x369   : > { %v512_v32 = vpop.f32.mrb[0].mxu1 }
 0x36a   : > { %v513_v33 = vadd.f32 %v1784_v31, %v512_v32  ;;  %v1543_v34 = vpop.f32.mrb[1].mxu1 }
 0x36c   : > { %v516_v35 = vsel %vm441_vm2, %v513_v33, -inf }
 0x36d   : > { %517 = vmax.xlane.f32.xlu1 %v516_v35  ;;  %v678_v36 = vpop.f32.mrb[2].mxu0 }
 0x36e   : > { %v679_v37 = vadd.f32 %v1784_v31, %v678_v36  ;;  %v1553_v38 = vpop.f32.mrb[3].mxu0 }
 0x370   : > { %v682_v39 = vsel %vm441_vm2, %v679_v37, -inf }
 0x371   : > { %683 = vmax.xlane.f32.xlu0 %v682_v39 }
 0x387   : > { %693 = vrot.lane.b32.xlu0 %v1764_v26, %s1659_s12 }
 0x3fa   : > { %v518_v40 = vpop.xlane.xlu1 %517 }
 0x3fb   : > { %v519_v41 = vsub.f32 %v513_v33, %v518_v40 }
 0x3fd   : > { %v520_v42 = vmul.f32 1.442695, %v519_v41 }
 0x3fe   : > { %v684_v43 = vpop.xlane.xlu0 %683 }
 0x3ff   : > { %1629 = vpow2.f32 %v520_v42  ;;  %v685_v44 = vsub.f32 %v679_v37, %v684_v43 }
 0x401   : > { %v686_v45 = vmul.f32 1.442695, %v685_v44 }
 0x402   : > { %v694_v56 = vpop.permute.xlu0 %693 }
 0x403   : > { %1631 = vpow2.f32 %v686_v45 }
 0x409   : > { %v1630_v46 = vpop.eup %1629 }
 0x40a   : > { %v522_v47 = vsel %vm441_vm2, %v1630_v46, 0.0 }
 0x40b   : > { %523 = vadd.xlane.f32.xlu1 %v522_v47 }
 0x40d   : > { %v1632_v48 = vpop.eup %1631 }
 0x40e   : > { %v688_v49 = vsel %vm441_vm2, %v1632_v48, 0.0 }
 0x40f   : > { %689 = vadd.xlane.f32.xlu1 %v688_v49 }
 0x420   : > { %527 = vrot.lane.b32.xlu1 %v1764_v26, %s1660_s13  ;;  %s314_s13 = scalar_lea.vmem %s1875_s8, %s1473_s29 }
 0x424   : > { %918 = vrot.lane.b32.xlu1 %v1764_v26, %s1661_s14 }
 0x428   : > { %916 = vrot.lane.b32.xlu1 %v1764_v26, %s1662_s15 }
 0x498   : > { %v524_v51 = vpop.xlane.xlu1 %523 }
 0x499   : > { %1633 = vrcp.f32 %v524_v51 }
 0x49c   : > { %v690_v52 = vpop.xlane.xlu1 %689 }
 0x49d   : > { %1635 = vrcp.f32 %v690_v52 }
 0x4a0   : > { %v528_v53 = vpop.permute.xlu1 %527 }
 0x4a1   : > { %1545 = vmatpush3.msra.mxu1 %v528_v53 }
 0x4a2   : > { %1554 = vmatprep.subr.mxu1 %v1655_v13 }
 0x4a3   : > { %v1634_v54 = vpop.eup %1633 }
 0x4a4   : > { %v526_v55 = vmul.f32 %v1634_v54, %v1630_v46  ;;  %v919_v62 = vpop.permute.xlu1 %918 }
 0x4a6   : > { %1547 = vmatmul.mubr.msk.f32.vlgmr.msra.gmra.mrb[2].mxu1 %vm441_vm2, %v526_v55 }
 0x4a7   : > { %v1636_v57 = vpop.eup %1635  ;;  %1555 = vmatpush3.msra.mxu1 %v694_v56  ;;  %1556 = vmatprep.mubr.msk.f32.mxu1 %vm1654_vm1, %v1655_v13 }
 0x4a8   : > { %v692_v58 = vmul.f32 %v1636_v57, %v1632_v48  ;;  %1564 = vmatprep.subr.mxu1 %v1655_v13  ;;  %v917_v2 = vpop.permute.xlu1 %916  ;;  %v1496_v48 = vld [vmem:[%s1871_s4] ss:$0 sm:$0xff] }
 0x4aa   : > { %1557 = vmatmul.mubr.msk.f32.vlgmr.msra.gmra.mrb[4].mxu1 %vm441_vm2, %v692_v58 }
 0x4ab   : > { %1566 = vmatprep.mubr.msk.f32.mxu1 %vm1654_vm1, %v1655_v13  ;;  %1565 = vmatpush3.msra.mxu1 %v603_v59 }
 0x4ac   : > { %1574 = vmatprep.subr.mxu1 %v1655_v13 }
 0x579   : > { %v599_v60 = vpop.f32.mrb[2].mxu1 }
 0x57a   : > { %v1548_v61 = vpop.f32.mrb[3].mxu1  ;;  %1567 = vmatmul.mubr.msk.f32.vlgmr.msra.gmra.mrb[6].mxu1 %vm441_vm2, %v599_v60 }
 0x57b   : > { %1576 = vmatprep.mubr.msk.f32.mxu1 %vm1654_vm1, %v1655_v13 }
 0x57d   : > { %v765_v63 = vpop.f32.mrb[4].mxu1 }
 0x57e   : > { %v1558_v1 = vpop.f32.mrb[5].mxu1  ;;  %1562 = vmatmul.mubr.msk.f32.vlgmr.msra.gmra.mrb[4].mxu0 %vm441_vm2, %v765_v63 }
 0x57f   : > { %1570 = vmatpush3.xpose.msk.msra.mxu0 %vm441_vm2, %v919_v62  ;;  %1571 = vmatprep.mubr.msk.f32.mxu0 %vm1654_vm1, %v1655_v13 }
 0x580   : > { %1579 = vmatprep.subr.mxu0 %v1655_v13 }
 0x582   : > { %1572 = vmatmul.mubr.msk.f32.vlgmr.msra.gmra.mrb[6].mxu0 %vm441_vm2, %v917_v2 }
 0x583   : > { %1581 = vmatprep.mubr.msk.f32.mxu0 %vm1654_vm1, %v1655_v13  ;;  %1580 = vmatpush3.msra.mxu0 %v1081_v24 }
 0x584   : > { %1589 = vmatprep.subr.mxu0 %v1655_v13 }
 0x64d   : > { %v912_v3 = vpop.f32.mrb[6].mxu1 }
 0x64e   : > { %v1568_v4 = vpop.f32.mrb[7].mxu1 }
 0x651   : > { %v839_v5 = vpop.f32.mrb[4].mxu0 }
 0x652   : > { %v913_v6 = vadd.f32 %v912_v3, %v839_v5  ;;  %v1563_v7 = vpop.f32.mrb[5].mxu0 }
 0x655   : > { %v990_v8 = vpop.f32.mrb[6].mxu0 }
 0x656   : > { %v991_v9 = vadd.f32 %v1784_v31, %v990_v8  ;;  %v1573_v10 = vpop.f32.mrb[7].mxu0 }
 0x658   : > { %v994_v11 = vsel %vm441_vm2, %v991_v9, -inf }
 0x659   : > { %995 = vmax.xlane.f32.xlu1 %v994_v11 }
 0x66a   : > { %1005 = vrot.lane.b32.xlu1 %v1764_v26, %s1663_s20 }
 0x66e   : > { %1156 = vrot.lane.b32.xlu1 %v1764_v26, %s1664_s21 }
 0x6e6   : > { %v996_v12 = vpop.xlane.xlu1 %995 }
 0x6e7   : > { %v997_v14 = vsub.f32 %v991_v9, %v996_v12 }
 0x6e9   : > { %v998_v15 = vmul.f32 1.442695, %v997_v14 }
 0x6ea   : > { %v1006_v16 = vpop.permute.xlu1 %1005 }
 0x6eb   : > { %1637 = vpow2.f32 %v998_v15  ;;  %1575 = vmatpush3.msra.mxu1 %v1006_v16 }
 0x6ec   : > { %1584 = vmatprep.subr.mxu1 %v1655_v13 }
 0x6ee   : > { %v1157_v23 = vpop.permute.xlu1 %1156 }
 0x6f5   : > { %v1638_v17 = vpop.eup %1637 }
 0x6f6   : > { %v1000_v18 = vsel %vm441_vm2, %v1638_v17, 0.0 }
 0x6f7   : > { %1001 = vadd.xlane.f32.xlu0 %v1000_v18 }
 0x70d   : > { %1158 = vrot.lane.b32.xlu0 %v1764_v26, %s1665_s22 }
 0x784   : > { %v1002_v19 = vpop.xlane.xlu0 %1001 }
 0x785   : > { %1639 = vrcp.f32 %v1002_v19 }
 0x788   : > { %v1159_v22 = vpop.permute.xlu0 %1158 }
 0x78f   : > { %v1640_v20 = vpop.eup %1639 }
 0x790   : > { %v1004_v21 = vmul.f32 %v1640_v20, %v1638_v17 }
 0x792   : > { %1577 = vmatmul.mubr.msk.f32.vlgmr.msra.gmra.mrb[8].mxu1 %vm441_vm2, %v1004_v21 }
 0x793   : > { %1585 = vmatpush3.xpose.msk.msra.mxu1 %vm441_vm2, %v1159_v22  ;;  %1586 = vmatprep.mubr.msk.f32.mxu1 %vm1654_vm1, %v1655_v13 }
 0x794   : > { %1594 = vmatprep.subr.mxu1 %v1655_v13 }
 0x796   : > { %1587 = vmatmul.mubr.msk.f32.vlgmr.msra.gmra.mrb[10].mxu1 %vm441_vm2, %v1157_v23 }
 0x797   : > { %1596 = vmatprep.mubr.msk.f32.mxu1 %vm1654_vm1, %v1655_v13 }
 0x865   : > { %v1077_v25 = vpop.f32.mrb[8].mxu1 }
 0x866   : > { %v1578_v27 = vpop.f32.mrb[9].mxu1  ;;  %1582 = vmatmul.mubr.msk.f32.vlgmr.msra.gmra.mrb[8].mxu0 %vm441_vm2, %v1077_v25 }
 0x867   : > { %1591 = vmatprep.mubr.msk.f32.mxu0 %vm1654_vm1, %v1655_v13  ;;  %v1321_v13 = vld [vmem:[%s1870_s3 + $0x18] sm:$0xff] }
 0x868   : > { %1595 = vmatpush3.msra.mxu1 %v1321_v13 }
 0x869   : > { %v1230_v28 = vpop.f32.mrb[10].mxu1 }
 0x86a   : > { %v1231_v29 = vadd.f32 %v1784_v31, %v1230_v28  ;;  %v1588_v30 = vpop.f32.mrb[11].mxu1 }
 0x86c   : > { %v1234_v32 = vsel %vm441_vm2, %v1231_v29, -inf }
 0x86d   : > { %1235 = vmax.xlane.f32.xlu1 %v1234_v32 }
 0x8fa   : > { %v1236_v33 = vpop.xlane.xlu1 %1235 }
 0x8fb   : > { %v1237_v34 = vsub.f32 %v1231_v29, %v1236_v33 }
 0x8fd   : > { %v1238_v35 = vmul.f32 1.442695, %v1237_v34 }
 0x8ff   : > { %1641 = vpow2.f32 %v1238_v35 }
 0x909   : > { %v1642_v36 = vpop.eup %1641 }
 0x90a   : > { %v1240_v37 = vsel %vm441_vm2, %v1642_v36, 0.0 }
 0x90b   : > { %1241 = vadd.xlane.f32.xlu0 %v1240_v37 }
 0x921   : > { %1245 = vrot.lane.b32.xlu0 %v1764_v26, %s1666_s25 }
 0x939   : > { %v1151_v31 = vpop.f32.mrb[8].mxu0 }
 0x93a   : > { %v1155_v38 = vadd.f32 %v1151_v31, %v913_v6  ;;  %v1583_v39 = vpop.f32.mrb[9].mxu0 }
 0x998   : > { %v1242_v40 = vpop.xlane.xlu0 %1241 }
 0x999   : > { %1643 = vrcp.f32 %v1242_v40 }
 0x99c   : > { %v1246_v41 = vpop.permute.xlu0 %1245 }
 0x99d   : > { %1590 = vmatpush3.msra.mxu0 %v1246_v41 }
 0x9a3   : > { %v1644_v42 = vpop.eup %1643 }
 0x9a4   : > { %v1244_v43 = vmul.f32 %v1644_v42, %v1642_v36 }
 0x9a6   : > { %1592 = vmatmul.mubr.msk.f32.vlgmr.msra.gmra.mrb[10].mxu0 %vm441_vm2, %v1244_v43 }
 0xa79   : > { %v1317_v44 = vpop.f32.mrb[10].mxu0 }
 0xa7a   : > { %v1593_v45 = vpop.f32.mrb[11].mxu0  ;;  %1597 = vmatmul.mubr.msk.f32.vlgmr.msra.gmra.mrb[12].mxu1 %vm441_vm2, %v1317_v44 }
 0xb4d   : > { %v1391_v26 = vpop.f32.mrb[12].mxu1 }
 0xb4e   : > { %v1395_v46 = vadd.f32 %v1391_v26, %v1155_v38  ;;  %v1598_v47 = vpop.f32.mrb[13].mxu1 }
 0xb50   : > { %v1396_v49 = vadd.f32 %v1395_v46, %v1728_v0 }
 0xb52   : > { %v1404_v50 = vadd.f32 %v1496_v48, %v1396_v49 }
 0xb54   : > { %1405 = vst.msk [vmem:[%s314_s13] sm:$0xff] %vm318_vm0, %v1404_v50 }
 0xb55 PF: > { %s18_s27 = sadd.s32 1, %s1651_s27  }
 0xb56   : > { %p15_p4 = scmp.ge.s32.totalorder %s18_s27, 4  }
 0xb58   :  { %17 = sbr.rel (!%p15_p4) target bundleno = 1 (0x1), region = 85 }

// kernel: encoder_decoder_forward.15
= control target key start
LH: loop header
LB: loop body
LE: loop exit
PB: predicated region body
PF: predicated region fallthrough
CT: control target
= control target key end

     0   :  { %s1938_s17 = smov 0   ;;  %s2117_s0 = inlined_call_operand.vmem [shape: f32[2,8,32], index: 0, kind: input, shape index: {}]   ;;  %s2118_s1 = inlined_call_operand.vmem [shape: f32[2,8,32], index: 1, kind: input, shape index: {}]   ;;  %s2119_s2 = inlined_call_operand.vmem [shape: f32[32,32], index: 2, kind: input, shape index: {}]   ;;  %s2120_s3 = inlined_call_operand.vmem [shape: f32[1,32], index: 3, kind: input, shape index: {}]   ;;  %s2121_s4 = inlined_call_operand.vmem [shape: f32[32,64], index: 4, kind: input, shape index: {}]   ;;  %s2122_s5 = inlined_call_operand.vmem [shape: f32[1,64], index: 5, kind: input, shape index: {}]   ;;  %s2123_s6 = inlined_call_operand.vmem [shape: f32[32,32], index: 6, kind: input, shape index: {}]   ;;  %s2124_s7 = inlined_call_operand.vmem [shape: f32[1,32], index: 7, kind: input, shape index: {}]   ;;  %s2125_s8 = inlined_call_operand.vmem [shape: f32[1,32], index: 8, kind: input, shape index: {}]   ;;  %s2126_s9 = inlined_call_operand.vmem [shape: f32[1,32], index: 9, kind: input, shape index: {}]   ;;  %s2127_s10 = inlined_call_operand.vmem [shape: f32[2,1,8], index: 10, kind: input, shape index: {}]   ;;  %s2128_s11 = inlined_call_operand.vmem [shape: f32[2,8,32], index: 11, kind: output, shape index: {}]  }
   0x1 LB: > { %s1662_s18 = sadd.s32 4294967295, %s1866_s17   ;;  %p1666_p0 = scmp.ge.s32.totalorder %s1866_s17, 1  ;;  %s1866_s17 = sphi %s1938_s17, %s21_s17  }
   0x2   : > { %p353_p1 = scmp.lt.s32.totalorder %s1866_s17, 3 }
   0x4   : > { %p354_p2 = pnand %p1666_p0, %p353_p1 }
   0x5   : > { %p398_p3 = scmp.lt.s32.totalorder (!%p354_p2), %s1662_s18, 1  ;;  %vm416_vm0 = vcmask (!%p354_p2), 261120   ;;  %v530_v7 = vld [vmem:[%s2121_s4] sm:$0xff] (!%p354_p2)  ;;  %v531_v8 = vld [vmem:[%s2121_s4 + $0x8] sm:$0xff] (!%p354_p2)  ;;  %v532_v9 = vld [vmem:[%s2121_s4 + $0x10] sm:$0xff] (!%p354_p2)  ;;  %v1868_v10 = vmov (!%p354_p2), 0.0|0.0  }
   0x6   : > { %357 = sbr.rel (%p354_p2) target bundleno = 2894 (0xb4e), region = 64  ;;  %1818 = vmatprep.subr.bf16.mxu1 (!%p354_p2), %v1868_v10  ;;  %v1819_v11 = vpack.c.bf16 (!%p354_p2), %v531_v8, %v530_v7  ;;  %1812 = vmatprep.subr.bf16.mxu0 (!%p354_p2), %v1868_v10  ;;  %v533_v12 = vld [vmem:[%s2121_s4 + $0x18] sm:$0xff] (!%p354_p2)  ;;  %v445_v13 = vld [vmem:[%s2119_s2] sm:$0xff] (!%p354_p2)  ;;  %v446_v14 = vld [vmem:[%s2119_s2 + $0x8] sm:$0xff] (!%p354_p2)  ;;  %vm1869_vm1 = vmmov (!%p354_p2), 0   ;;  %v1870_v16 = vmov (!%p354_p2), 0.0  }
   0x7   : > { %v1813_v15 = vpack.c.bf16 (!%p354_p2), %v446_v14, %v445_v13  ;;  %1749 = vmatprep.mubr.msk.f32.mxu1 (!%p354_p2), %vm1869_vm1, %v1870_v16  ;;  %v447_v17 = vld [vmem:[%s2119_s2 + $0x10] sm:$0xff] (!%p354_p2)  ;;  %v448_v18 = vld [vmem:[%s2119_s2 + $0x18] sm:$0xff] (!%p354_p2)  ;;  %1738 = vmatprep.mubr.msk.f32.mxu0 (!%p354_p2), %vm1869_vm1, %v1870_v16  ;;  %v1822_v19 = vpack.c.bf16 (!%p354_p2), %v533_v12, %v532_v9  ;;  %v1670_v26 = vld [vmem:[%s2125_s8] ss:$0 sm:$0xff] (!%p354_p2)  ;;  %vm621_vm2 = vcmask (!%p354_p2), 64512   ;;  %s1871_s13 = smov (!%p354_p2), 120  }
   0x8   : > { %1820 = vmatpush3.bf16.msra.mxu1 (!%p354_p2), %v1819_v11  ;;  %v1816_v20 = vpack.c.bf16 (!%p354_p2), %v448_v18, %v447_v17  ;;  %v1671_v28 = vld [vmem:[%s2126_s9] ss:$0 sm:$0xff] (!%p354_p2)  ;;  %s1874_s23 = smov (!%p354_p2), 88   ;;  %s1875_s28 = smov (!%p354_p2), 80  }
   0x9   : > { %1821 = vmatprep.subr.bf16.mxu1 (!%p354_p2), %v1868_v10  ;;  %1814 = vmatpush3.bf16.msra.mxu0 (!%p354_p2), %v1813_v15  ;;  %v1674_v31 = vld [vmem:[%s2122_s5] ss:$0 sm:$0xff] (!%p354_p2)  ;;  %s1876_s29 = smov (!%p354_p2), 104  }
   0xa   : > { %1815 = vmatprep.subr.bf16.mxu0 (!%p354_p2), %v1868_v10  ;;  %v1672_v35 = vld [vmem:[%s2120_s3] ss:$0 sm:$0xff] (!%p354_p2) }
   0xc   : > { %1823 = vmatpush3.bf16.msra.mxu1 (!%p354_p2), %v1822_v19 }
   0xd   : > { %s2130_s18 = smov (!%p398_p3, %s1662_s18), 1  ;;  %1817 = vmatpush3.bf16.msra.mxu0 %v1816_v20  ;;  %1757 = vmatprep.subr.mxu1 %v1870_v16 }
   0xe   : > { %s1949_s19 = sshll.u32 %s2130_s18, 3  ;;  %1752 = vmatprep.subr.mxu0 %v1870_v16  ;;  %s408_s21 = scalar_lea.vmem %s2127_s10, %s2130_s18 }
   0xf   : > { %s401_s22 = scalar_lea.vmem %s2117_s0, %s1949_s19  ;;  %s405_s25 = scalar_lea.vmem %s2118_s1, %s1949_s19  ;;  %v2035_v41 = vld [vmem:[%s408_s21] ss:$0 sm:$0xff] }
  0x10   : > { %v1955_v0 = vld [vmem:[%s401_s22] sm:$0xff]  ;;  %s1872_s22 = smov 96   ;;  %s1873_s18 = smov 112  }
  0x11   : > { %v417_v1 = vsel %vm416_vm0, %v1955_v0, 0.0  ;;  %v529_v21 = vld [vmem:[%s405_s25] sm:$0xff] }
  0x12   : > { %418 = vadd.xlane.f32.xlu0 %v417_v1  ;;  %1750 = vmatmul.mubr.msk.f32.vlgmr.msra.gmra.mrb[0].mxu1 %vm416_vm0, %v529_v21  ;;  %v951_v1 = vld [vmem:[%s2123_s6 + $0x8] sm:$0xff] }
  0x13   : > { %1759 = vmatprep.mubr.msk.f32.mxu1 %vm1869_vm1, %v1870_v16 }
  0x9f   : > { %v419_v2 = vpop.xlane.xlu0 %418 }
  0xa0   : > { %v421_v3 = vmul.f32 0.03125, %v419_v2 }
  0xa2   : > { %v422_v4 = vsub.f32 %v1955_v0, %v421_v3 }
  0xa4   : > { %v423_v5 = vmul.f32 %v422_v4, %v422_v4 }
  0xa6   : > { %v424_v6 = vsel %vm416_vm0, %v423_v5, 0.0 }
  0xa7   : > { %425 = vadd.xlane.f32.xlu0 %v424_v6  ;;  %v785_v6 = vld [vmem:[%s2123_s6] sm:$0xff] }
  0xe5   : > { %v610_v32 = vpop.f32.mrb[0].mxu1 }
  0xe6   : > { %v2010_v33 = vadd.f32 %v1674_v31, %v610_v32  ;;  %v1751_v34 = vpop.f32.mrb[1].mxu1 }
  0xe8   : > { %788 = vrot.lane.b32.xlu1 %v2010_v33, %s1871_s13 }
 0x134   : > { %v426_v22 = vpop.xlane.xlu0 %425 }
 0x135   : > { %v427_v23 = vmul.f32 0.03125, %v426_v22 }
 0x137   : > { %v428_v24 = vadd.f32 1e-05, %v427_v23 }
 0x139   : > { %1842 = vrsqrt.f32 %v428_v24 }
 0x143   : > { %v1843_v25 = vpop.eup %1842 }
 0x144   : > { %v430_v27 = vmul.f32 %v1843_v25, %v422_v4 }
 0x146   : > { %v437_v29 = vmul.f32 %v1670_v26, %v430_v27 }
 0x148   : > { %v444_v30 = vadd.f32 %v1671_v28, %v437_v29 }
 0x14a   : > { %1739 = vmatmul.mubr.msk.f32.vlgmr.msra.gmra.mrb[0].mxu0 %vm416_vm0, %v444_v30 }
 0x14b   : > { %1754 = vmatprep.mubr.msk.f32.mxu0 %vm1869_vm1, %v1870_v16  ;;  %1753 = vmatpush3.xpose.msk.msra.mxu0 %vm621_vm2, %v2010_v33 }
 0x14c   : > { %1762 = vmatprep.subr.mxu0 %v1870_v16 }
 0x15a   : > { %v789_v39 = vpop.permute.xlu1 %788 }
 0x21d   : > { %v525_v36 = vpop.f32.mrb[0].mxu0 }
 0x21e   : > { %v2019_v37 = vadd.f32 %v1672_v35, %v525_v36  ;;  %v1740_v38 = vpop.f32.mrb[1].mxu0  ;;  %v1263_v35 = vld [vmem:[%s2123_s6 + $0x10] sm:$0xff] }
 0x220   : > { %786 = vrot.lane.b32.xlu1 %v2019_v37, %s1871_s13  ;;  %1755 = vmatmul.mubr.msk.f32.vlgmr.msra.gmra.mrb[2].mxu0 %vm621_vm2, %v2019_v37  ;;  %s1877_s13 = smov 72  }
 0x221   : > { %1763 = vmatpush3.xpose.msk.msra.mxu0 %vm621_vm2, %v789_v39  ;;  %1764 = vmatprep.mubr.msk.f32.mxu0 %vm1869_vm1, %v1870_v16 }
 0x222   : > { %1772 = vmatprep.subr.mxu0 %v1870_v16 }
 0x292   : > { %v787_v40 = vpop.permute.xlu1 %786 }
 0x293   : > { %1765 = vmatmul.mubr.msk.f32.vlgmr.msra.gmra.mrb[4].mxu0 %vm621_vm2, %v787_v40 }
 0x294   : > { %1774 = vmatprep.mubr.msk.f32.mxu0 %vm1869_vm1, %v1870_v16  ;;  %1773 = vmatpush3.msra.mxu0 %v951_v1 }
 0x295   : > { %1782 = vmatprep.subr.mxu0 %v1870_v16 }
 0x2f3   : > { %v694_v42 = vpop.f32.mrb[2].mxu0 }
 0x2f4   : > { %v695_v43 = vadd.f32 %v2035_v41, %v694_v42  ;;  %v1756_v44 = vpop.f32.mrb[3].mxu0 }
 0x2f6   : > { %v698_v45 = vsel %vm621_vm2, %v695_v43, -inf }
 0x2f7   : > { %699 = vmax.xlane.f32.xlu0 %v698_v45 }
 0x30d   : > { %709 = vrot.lane.b32.xlu0 %v2010_v33, %s1872_s22 }
 0x366   : > { %v860_v46 = vpop.f32.mrb[4].mxu0 }
 0x367   : > { %v861_v47 = vadd.f32 %v2035_v41, %v860_v46  ;;  %v1766_v48 = vpop.f32.mrb[5].mxu0 }
 0x369   : > { %v864_v49 = vsel %vm621_vm2, %v861_v47, -inf }
 0x36a   : > { %865 = vmax.xlane.f32.xlu1 %v864_v49 }
 0x37b   : > { %1100 = vrot.lane.b32.xlu1 %v2010_v33, %s1873_s18 }
 0x384   : > { %v700_v50 = vpop.xlane.xlu0 %699 }
 0x385   : > { %v701_v51 = vsub.f32 %v695_v43, %v700_v50 }
 0x387   : > { %v702_v52 = vmul.f32 1.442695, %v701_v51 }
 0x388   : > { %v710_v53 = vpop.permute.xlu0 %709 }
 0x389   : > { %1844 = vpow2.f32 %v702_v52  ;;  %1758 = vmatpush3.msra.mxu1 %v710_v53 }
 0x38a   : > { %1767 = vmatprep.subr.mxu1 %v1870_v16 }
 0x393   : > { %v1845_v54 = vpop.eup %1844 }
 0x394   : > { %v704_v55 = vsel %vm621_vm2, %v1845_v54, 0.0 }
 0x395   : > { %705 = vadd.xlane.f32.xlu0 %v704_v55 }
 0x3f7   : > { %v866_v56 = vpop.xlane.xlu1 %865 }
 0x3f8   : > { %v867_v57 = vsub.f32 %v861_v47, %v866_v56 }
 0x3fa   : > { %v868_v58 = vmul.f32 1.442695, %v867_v57 }
 0x3fb   : > { %v1101_v10 = vpop.permute.xlu1 %1100 }
 0x3fc   : > { %1846 = vpow2.f32 %v868_v58  ;;  %v1693_v58 = vld [vmem:[%s2124_s7] ss:$0 sm:$0xff] }
 0x406   : > { %v1847_v59 = vpop.eup %1846 }
 0x407   : > { %v870_v60 = vsel %vm621_vm2, %v1847_v59, 0.0 }
 0x408   : > { %871 = vadd.xlane.f32.xlu0 %v870_v60 }
 0x41e   : > { %875 = vrot.lane.b32.xlu0 %v2010_v33, %s1874_s23 }
 0x422   : > { %v706_v61 = vpop.xlane.xlu0 %705  ;;  %1098 = vrot.lane.b32.xlu0 %v2019_v37, %s1873_s18  ;;  %s412_s18 = scalar_lea.vmem %s2128_s11, %s1949_s19 }
 0x423   : > { %1848 = vrcp.f32 %v706_v61 }
 0x42d   : > { %v1849_v62 = vpop.eup %1848 }
 0x42e   : > { %v708_v63 = vmul.f32 %v1849_v62, %v1845_v54 }
 0x430   : > { %1760 = vmatmul.mubr.msk.f32.vlgmr.msra.gmra.mrb[2].mxu1 %vm621_vm2, %v708_v63 }
 0x431   : > { %1769 = vmatprep.mubr.msk.f32.mxu1 %vm1869_vm1, %v1870_v16 }
 0x495   : > { %v872_v2 = vpop.xlane.xlu0 %871 }
 0x496   : > { %1850 = vrcp.f32 %v872_v2 }
 0x499   : > { %v876_v3 = vpop.permute.xlu0 %875 }
 0x49a   : > { %1768 = vmatpush3.msra.mxu1 %v876_v3 }
 0x49b   : > { %1777 = vmatprep.subr.mxu1 %v1870_v16 }
 0x49d   : > { %v1099_v12 = vpop.permute.xlu0 %1098 }
 0x4a0   : > { %v1851_v4 = vpop.eup %1850 }
 0x4a1   : > { %v874_v5 = vmul.f32 %v1851_v4, %v1847_v59 }
 0x4a3   : > { %1770 = vmatmul.mubr.msk.f32.vlgmr.msra.gmra.mrb[4].mxu1 %vm621_vm2, %v874_v5 }
 0x4a4   : > { %1778 = vmatpush3.msra.mxu1 %v785_v6  ;;  %1779 = vmatprep.mubr.msk.f32.mxu1 %vm1869_vm1, %v1870_v16 }
 0x4a5   : > { %1787 = vmatprep.subr.mxu1 %v1870_v16 }
 0x503   : > { %v781_v7 = vpop.f32.mrb[2].mxu1 }
 0x504   : > { %v1761_v8 = vpop.f32.mrb[3].mxu1  ;;  %1780 = vmatmul.mubr.msk.f32.vlgmr.msra.gmra.mrb[6].mxu1 %vm621_vm2, %v781_v7 }
 0x505   : > { %1789 = vmatprep.mubr.msk.f32.mxu1 %vm1869_vm1, %v1870_v16 }
 0x576   : > { %v947_v9 = vpop.f32.mrb[4].mxu1 }
 0x577   : > { %v1771_v11 = vpop.f32.mrb[5].mxu1  ;;  %1775 = vmatmul.mubr.msk.f32.vlgmr.msra.gmra.mrb[6].mxu0 %vm621_vm2, %v947_v9 }
 0x578   : > { %1783 = vmatpush3.xpose.msk.msra.mxu0 %vm621_vm2, %v1101_v10  ;;  %1784 = vmatprep.mubr.msk.f32.mxu0 %vm1869_vm1, %v1870_v16 }
 0x579   : > { %1792 = vmatprep.subr.mxu0 %v1870_v16 }
 0x57b   : > { %1785 = vmatmul.mubr.msk.f32.vlgmr.msra.gmra.mrb[8].mxu0 %vm621_vm2, %v1099_v12 }
 0x57c   : > { %1794 = vmatprep.mubr.msk.f32.mxu0 %vm1869_vm1, %v1870_v16  ;;  %1793 = vmatpush3.msra.mxu0 %v1263_v35 }
 0x57d   : > { %1802 = vmatprep.subr.mxu0 %v1870_v16 }
 0x5d7   : > { %v1094_v13 = vpop.f32.mrb[6].mxu1 }
 0x5d8   : > { %v1781_v14 = vpop.f32.mrb[7].mxu1 }
 0x64a   : > { %v1021_v15 = vpop.f32.mrb[6].mxu0 }
 0x64b   : > { %v1095_v17 = vadd.f32 %v1094_v13, %v1021_v15  ;;  %v1776_v18 = vpop.f32.mrb[7].mxu0 }
 0x64e   : > { %v1172_v19 = vpop.f32.mrb[8].mxu0 }
 0x64f   : > { %v1173_v20 = vadd.f32 %v2035_v41, %v1172_v19  ;;  %v1786_v21 = vpop.f32.mrb[9].mxu0 }
 0x651   : > { %v1176_v22 = vsel %vm621_vm2, %v1173_v20, -inf }
 0x652   : > { %1177 = vmax.xlane.f32.xlu0 %v1176_v22 }
 0x668   : > { %1187 = vrot.lane.b32.xlu0 %v2010_v33, %s1875_s28 }
 0x66c   : > { %1338 = vrot.lane.b32.xlu0 %v2019_v37, %s1876_s29 }
 0x6df   : > { %v1178_v23 = vpop.xlane.xlu0 %1177 }
 0x6e0   : > { %v1179_v24 = vsub.f32 %v1173_v20, %v1178_v23 }
 0x6e2   : > { %v1180_v25 = vmul.f32 1.442695, %v1179_v24 }
 0x6e3   : > { %v1188_v26 = vpop.permute.xlu0 %1187 }
 0x6e4   : > { %1852 = vpow2.f32 %v1180_v25  ;;  %1788 = vmatpush3.msra.mxu1 %v1188_v26 }
 0x6e5   : > { %1797 = vmatprep.subr.mxu1 %v1870_v16 }
 0x6e7   : > { %v1339_v34 = vpop.permute.xlu0 %1338 }
 0x6ee   : > { %v1853_v27 = vpop.eup %1852 }
 0x6ef   : > { %v1182_v28 = vsel %vm621_vm2, %v1853_v27, 0.0 }
 0x6f0   : > { %1183 = vadd.xlane.f32.xlu1 %v1182_v28 }
 0x701   : > { %1340 = vrot.lane.b32.xlu1 %v2010_v33, %s1876_s29 }
 0x77d   : > { %v1184_v29 = vpop.xlane.xlu1 %1183 }
 0x77e   : > { %1854 = vrcp.f32 %v1184_v29 }
 0x781   : > { %v1341_v32 = vpop.permute.xlu1 %1340 }
 0x788   : > { %v1855_v30 = vpop.eup %1854 }
 0x789   : > { %v1186_v31 = vmul.f32 %v1855_v30, %v1853_v27 }
 0x78b   : > { %1790 = vmatmul.mubr.msk.f32.vlgmr.msra.gmra.mrb[8].mxu1 %vm621_vm2, %v1186_v31 }
 0x78c   : > { %1798 = vmatpush3.xpose.msk.msra.mxu1 %vm621_vm2, %v1341_v32  ;;  %1799 = vmatprep.mubr.msk.f32.mxu1 %vm1869_vm1, %v1870_v16 }
 0x78d   : > { %1807 = vmatprep.subr.mxu1 %v1870_v16 }
 0x78f   : > { %1800 = vmatmul.mubr.msk.f32.vlgmr.msra.gmra.mrb[10].mxu1 %vm621_vm2, %v1339_v34 }
 0x790   : > { %1809 = vmatprep.mubr.msk.f32.mxu1 %vm1869_vm1, %v1870_v16 }
 0x85e   : > { %v1259_v36 = vpop.f32.mrb[8].mxu1 }
 0x85f   : > { %v1791_v37 = vpop.f32.mrb[9].mxu1  ;;  %1795 = vmatmul.mubr.msk.f32.vlgmr.msra.gmra.mrb[10].mxu0 %vm621_vm2, %v1259_v36 }
 0x860   : > { %1804 = vmatprep.mubr.msk.f32.mxu0 %vm1869_vm1, %v1870_v16  ;;  %v1503_v16 = vld [vmem:[%s2123_s6 + $0x18] sm:$0xff] }
 0x861   : > { %1808 = vmatpush3.msra.mxu1 %v1503_v16 }
 0x862   : > { %v1412_v38 = vpop.f32.mrb[10].mxu1 }
 0x863   : > { %v1413_v39 = vadd.f32 %v2035_v41, %v1412_v38  ;;  %v1801_v40 = vpop.f32.mrb[11].mxu1 }
 0x865   : > { %v1416_v42 = vsel %vm621_vm2, %v1413_v39, -inf }
 0x866   : > { %1417 = vmax.xlane.f32.xlu0 %v1416_v42 }
 0x87c   : > { %1427 = vrot.lane.b32.xlu0 %v2010_v33, %s1877_s13 }
 0x8f3   : > { %v1418_v43 = vpop.xlane.xlu0 %1417 }
 0x8f4   : > { %v1419_v44 = vsub.f32 %v1413_v39, %v1418_v43 }
 0x8f6   : > { %v1420_v45 = vmul.f32 1.442695, %v1419_v44 }
 0x8f7   : > { %v1428_v46 = vpop.permute.xlu0 %1427 }
 0x8f8   : > { %1856 = vpow2.f32 %v1420_v45  ;;  %1803 = vmatpush3.msra.mxu0 %v1428_v46 }
 0x902   : > { %v1857_v47 = vpop.eup %1856 }
 0x903   : > { %v1422_v48 = vsel %vm621_vm2, %v1857_v47, 0.0 }
 0x904   : > { %1423 = vadd.xlane.f32.xlu1 %v1422_v48 }
 0x932   : > { %v1333_v41 = vpop.f32.mrb[10].mxu0 }
 0x933   : > { %v1337_v49 = vadd.f32 %v1333_v41, %v1095_v17  ;;  %v1796_v50 = vpop.f32.mrb[11].mxu0 }
 0x991   : > { %v1424_v33 = vpop.xlane.xlu1 %1423 }
 0x992   : > { %1858 = vrcp.f32 %v1424_v33 }
 0x99c   : > { %v1859_v51 = vpop.eup %1858 }
 0x99d   : > { %v1426_v52 = vmul.f32 %v1859_v51, %v1857_v47 }
 0x99f   : > { %1805 = vmatmul.mubr.msk.f32.vlgmr.msra.gmra.mrb[12].mxu0 %vm621_vm2, %v1426_v52 }
 0xa72   : > { %v1499_v53 = vpop.f32.mrb[12].mxu0 }
 0xa73   : > { %v1806_v54 = vpop.f32.mrb[13].mxu0  ;;  %1810 = vmatmul.mubr.msk.f32.vlgmr.msra.gmra.mrb[12].mxu1 %vm621_vm2, %v1499_v53 }
 0xb46   : > { %v1573_v55 = vpop.f32.mrb[12].mxu1 }
 0xb47   : > { %v1577_v56 = vadd.f32 %v1573_v55, %v1337_v49  ;;  %v1811_v57 = vpop.f32.mrb[13].mxu1 }
 0xb49   : > { %v1578_v59 = vadd.f32 %v1577_v56, %v1955_v0 }
 0xb4b   : > { %v1586_v60 = vadd.f32 %v1693_v58, %v1578_v59 }
 0xb4d   : > { %1587 = vst.msk [vmem:[%s412_s18] sm:$0xff] %vm416_vm0, %v1586_v60 }
 0xb4e PF: > { %s21_s17 = sadd.s32 1, %s1866_s17  }
 0xb4f   : > { %p18_p4 = scmp.ge.s32.totalorder %s21_s17, 4  }
 0xb51   :  { %20 = sbr.rel (!%p18_p4) target bundleno = 1 (0x1), region = 100 }

// kernel: encoder_decoder_forward.17
= control target key start
LH: loop header
LB: loop body
LE: loop exit
PB: predicated region body
PF: predicated region fallthrough
CT: control target
= control target key end

     0   :  { %vm19_vm0 = vcmask 261120   ;;  %s167_s0 = inlined_call_operand.vmem [shape: f32[16,32], index: 0, kind: input, shape index: {}]   ;;  %s168_s1 = inlined_call_operand.vmem [shape: f32[1,32], index: 1, kind: input, shape index: {}]   ;;  %s169_s2 = inlined_call_operand.vmem [shape: f32[1,32], index: 2, kind: input, shape index: {}]   ;;  %s170_s3 = inlined_call_operand.hbm [shape: f32[16,32], index: 3, kind: output, shape index: {}]  }
   0x1   :  { %v15_v0 = vld [vmem:[%s167_s0] sm:$0xff]  ;;  %v16_v1 = vld [vmem:[%s167_s0 + $0x8] sm:$0xff] }
   0x2   :  { %8 = vsyncpa [#allocation3], 0  ;;  %v20_v2 = vsel %vm19_vm0, %v15_v0, 0.0  ;;  %v23_v3 = vsel %vm19_vm0, %v16_v1, 0.0  ;;  %v81_v21 = vld [vmem:[%s168_s1] ss:$0 sm:$0xff] }
   0x3   :  { %21 = vadd.xlane.f32.xlu0 %v20_v2  ;;  %v82_v23 = vld [vmem:[%s169_s2] ss:$0 sm:$0xff]  ;;  %s114_s19 = smov [#allocation2]  }
   0x4   :  { %s70_s20 = sshll.u32 %s114_s19, 4  ;;  %s71_s20 = int_to_ptr.vmem [resolvable:$true] %s70_s20 }
   0x5   :  { %s90_s21 = scalar_lea.vmem %s71_s20, 256  ;;  %p95_p1 = scmp.lt.s32.totalorder %s71_s20, %s71_s20 }
   0x6   :  { %p91_p0 = scmp.ne.s32.totalorder %s71_s20, %s90_s21  ;;  %p96_p2 = scmp.lt.s32.totalorder %s90_s21, %s90_s21 }
   0x7   :  { %24 = vadd.xlane.f32.xlu0 %v23_v3 }
   0x8   :  { %p97_p3 = por %p96_p2, %p95_p1 }
   0xa   :  { %p98_p4 = pnand %p97_p3, %p91_p0 }
  0x90   :  { %v22_v4 = vpop.xlane.xlu0 %21 }
  0x91   :  { %v27_v5 = vmul.f32 0.03125, %v22_v4 }
  0x93   :  { %v29_v6 = vsub.f32 %v15_v0, %v27_v5 }
  0x94   :  { %v25_v7 = vpop.xlane.xlu0 %24 }
  0x95   :  { %v28_v8 = vmul.f32 0.03125, %v25_v7  ;;  %v31_v9 = vmul.f32 %v29_v6, %v29_v6 }
  0x97   :  { %v30_v10 = vsub.f32 %v16_v1, %v28_v8  ;;  %v33_v11 = vsel %vm19_vm0, %v31_v9, 0.0 }
  0x98   :  { %34 = vadd.xlane.f32.xlu1 %v33_v11 }
  0x99   :  { %v32_v12 = vmul.f32 %v30_v10, %v30_v10 }
  0x9b   :  { %v36_v13 = vsel %vm19_vm0, %v32_v12, 0.0 }
  0x9c   :  { %37 = vadd.xlane.f32.xlu1 %v36_v13 }
 0x125   :  { %v35_v14 = vpop.xlane.xlu1 %34 }
 0x126   :  { %v39_v15 = vmul.f32 0.03125, %v35_v14 }
 0x128   :  { %v41_v16 = vadd.f32 1e-05, %v39_v15 }
 0x129   :  { %v38_v17 = vpop.xlane.xlu1 %37 }
 0x12a   :  { %86 = vrsqrt.f32 %v41_v16  ;;  %v40_v18 = vmul.f32 0.03125, %v38_v17 }
 0x12c   :  { %v42_v19 = vadd.f32 1e-05, %v40_v18 }
 0x12e   :  { %88 = vrsqrt.f32 %v42_v19 }
 0x134   :  { %v87_v20 = vpop.eup %86 }
 0x135   :  { %v45_v22 = vmul.f32 %v87_v20, %v29_v6 }
 0x137   :  { %v53_v24 = vmul.f32 %v81_v21, %v45_v22 }
 0x138   :  { %v89_v25 = vpop.eup %88 }
 0x139   :  { %v46_v26 = vmul.f32 %v89_v25, %v30_v10  ;;  %v61_v27 = vadd.f32 %v82_v23, %v53_v24 }
 0x13b   :  { %v54_v28 = vmul.f32 %v81_v21, %v46_v26  ;;  %63 = vst.msk [vmem:[#allocation2] sm:$0xff] %vm19_vm0, %v61_v27 }
 0x13d   :  { %v62_v29 = vadd.f32 %v82_v23, %v54_v28 }
 0x13f   :  { %64 = vst.msk [vmem:[#allocation2 + $0x8] sm:$0xff] %vm19_vm0, %v62_v29 }
 0x140   :  { %101 = shalt.err (!%p98_p4)
}
 0x141   :  { %s102_s22 = scalar_lea.hbm %s170_s3, 256 }
 0x142   :  { %p103_p5 = scmp.ne.s32.totalorder %s170_s3, %s102_s22  ;;  %p106_p6 = scmp.lt.u32.totalorder %s102_s22, %s170_s3 }
 0x144   :  { %p108_p7 = pnand %p106_p6, %p103_p5 }
 0x146   :  { %111 = shalt.err (!%p108_p7)
}
 0x147   :  { %s115_s27 = smov 128   ;;  %s116_s28 = smov 8  }
 0x148   :  { %76 = dma.vmem_to_hbm [thread:$0]  %s71_s20, 256, %s170_s3, [#allocation3], %s115_s27, %s115_s27, %s116_s28  }
 0x149   :  { %112 = dma.done.wait [#allocation3], 256  }
 0x14a   :  { %113 = vsyncadd [#allocation3], 4294967040 }
 0x14b   :  { %80 = vsyncpa [#allocation3], 1 }

</bundles_post_ra>
